<compile_context>
chip_gen: v6e
topology: v6e:2x2x1
jax: 0.10.0
libtpu: 0.0.40
codegen_flags: <defaults>
</compile_context>

<pallas_src>
import numpy as np
import jax
import jax.numpy as jnp
from jax import lax
from jax.experimental import pallas as pl
from jax.experimental.pallas import tpu as pltpu


def residual_hourglass_pallas(x_nhwc, p, images_per_block=1):
    N, H, W, C = x_nhwc.shape
    Ch = p['w1'].shape[3]
    OH, OW = H // 2, W // 2
    MW = OW * Ch           # merged hidden lane width
    MC = OW * C            # merged full-channel lane width (pre-upsample)
    LANES = 2 * W * C      # dense output lane width (two image rows per dense row)
    assert H % 2 == 0 and W % 2 == 0 and LANES % 128 == 0
    assert N % images_per_block == 0
    NB = images_per_block  # images handled per grid step (fold batch on v5e/v6e)
    G = N // NB
    f32 = jnp.float32

    # -------------- wrapper-side layout plumbing (pure data movement) --------------
    # Lane-dense view of x for the residual add / output store.
    x_dense = x_nhwc.reshape(N, H // 2, LANES)

    # im2col slab for blocks[0:3]'s stride-2 3x3 conv (reflection pad done here;
    # ReLU commutes with the pad and is applied inside the kernel).
    xpad = jnp.pad(x_nhwc, ((0, 0), (1, 1), (1, 1), (0, 0)), mode='reflect')
    cols = [xpad[:, kh:kh + 2 * OH:2, kw:kw + 2 * OW:2, :]
            for kh in range(3) for kw in range(3)]
    im = jnp.stack(cols, axis=3).reshape(N, OH, OW * 9 * C)   # (N, OH, OW*9*C)

    eye = jnp.eye(OW, dtype=f32)
    # Block-diagonal / fused weights so every conv is a single lane-merged matmul.
    w1_bd = jnp.einsum('pq,kc->pkqc', eye,
                       p['w1'].reshape(9 * C, Ch)).reshape(OW * 9 * C, MW)
    wpw_bd = jnp.einsum('pq,bij->bpiqj', eye, p['wpw']).reshape(3, MW, MW)
    w2_bd = jnp.einsum('pq,tic->tpiqc', eye,
                       p['w2'].reshape(9, Ch, C)).reshape(9 * MW, MC)
    # ConvTranspose weight arranged to emit directly into the dense output rows:
    # col index = a*(W*C) + (2*j + b)*C + co.
    wt_bd = jnp.einsum('jq,abic->jiaqbc', eye, p['wt']).reshape(MC, LANES)

    # Packed, pre-tiled per-lane constants (one DMA instead of many tiny ones).
    hc = jnp.concatenate([jnp.tile(p['bnh_scale'], (1, OW)),            # rows 0..6
                          jnp.tile(p['bnh_shift'], (1, OW)),            # rows 7..13
                          jnp.tile(p['wdw'].reshape(27, Ch), (1, OW))], # rows 14..40
                         axis=0)                                         # (41, MW)
    cc = jnp.stack([jnp.tile(p['bnc_scale'][0], OW),
                    jnp.tile(p['bnc_shift'][0], OW)])                    # (2, MC)
    sc1, sh1 = p['bnc_scale'][1], p['bnc_shift'][1]
    dd = jnp.stack([jnp.tile(sc1, 2 * W),
                    jnp.tile(p['bt'][0] * sc1 + sh1, 2 * W)])            # (2, LANES)

    def dot(a, b):
        # Default MXU precision (bf16 inputs, f32 accumulate). For tighter f32
        # parity use precision=lax.Precision.HIGHEST (cheap at these K sizes).
        return jnp.dot(a, b, preferred_element_type=f32)

    def pad_merged(r, d, cw):
        """ReflectionPad2d(d) on a lane-merged (rows, cols*cw) slab."""
        nrow = r.shape[0]
        ncol = r.shape[1] // cw
        left = [r[:, (d - q) * cw:(d - q + 1) * cw] for q in range(d)]
        right = [r[:, (ncol - 2 - q) * cw:(ncol - 1 - q) * cw] for q in range(d)]
        rw = jnp.concatenate(left + [r] + right, axis=1)
        top = [rw[k:k + 1] for k in range(d, 0, -1)]
        bot = [rw[k:k + 1] for k in range(nrow - 2, nrow - 2 - d, -1)]
        return jnp.concatenate(top + [rw] + bot, axis=0)

    def kernel(x_ref, im_ref, w1_ref, wpw_ref, w2_ref, wt_ref,
               hc_ref, cc_ref, dd_ref, o_ref):
        for t in range(NB):   # NB=1 keeps batch on the grid (both v7x TCs busy)
            # blocks[0:3]: ReLU -> ReflectionPad(1) -> Conv3x3 s2, one fused matmul.
            h = dot(jnp.maximum(im_ref[t], 0.0), w1_ref[...])            # (OH, MW)
            h = h * hc_ref[0:1, :] + hc_ref[7:8, :]                      # blocks[3] BN

            # blocks[4:7]: three SepResidualBlocks (dilations 1, 2, 1).
            for b, d in enumerate((1, 2, 1)):
                r = jnp.maximum(h, 0.0)
                rp = pad_merged(r, d, Ch)
                acc = jnp.zeros((OH, MW), f32)
                for kh in range(3):                    # depthwise 3x3 on the VPU
                    for kw in range(3):
                        row = 14 + b * 9 + kh * 3 + kw
                        acc = acc + (rp[kh * d:kh * d + OH,
                                        kw * d * Ch:kw * d * Ch + MW]
                                     * hc_ref[row:row + 1, :])
                acc = (acc * hc_ref[1 + 2 * b:2 + 2 * b, :]
                       + hc_ref[8 + 2 * b:9 + 2 * b, :])
                acc = jnp.maximum(acc, 0.0)
                acc = dot(acc, wpw_ref[b])             # 1x1 conv (block-diag weight)
                acc = (acc * hc_ref[2 + 2 * b:3 + 2 * b, :]
                       + hc_ref[9 + 2 * b:10 + 2 * b, :])
                h = h + acc

            # blocks[7:12]: ReLU -> Pad(1) -> Conv3x3 s1 (Ch->C) -> BN -> ReLU,
            # all 9 taps fused into a single K=9*MW matmul.
            rp = pad_merged(jnp.maximum(h, 0.0), 1, Ch)
            taps = jnp.concatenate(
                [rp[kh:kh + OH, kw * Ch:kw * Ch + MW]
                 for kh in range(3) for kw in range(3)], axis=1)          # (OH, 9*MW)
            g2 = dot(taps, w2_ref[...])                                   # (OH, MC)
            g2 = jnp.maximum(g2 * cc_ref[0:1, :] + cc_ref[1:2, :], 0.0)

            # blocks[12:14]: ConvTranspose(k=2,s=2)+bias -> BN, one matmul landing
            # directly in the lane-dense output layout; then the residual add.
            up = dot(g2, wt_ref[...])                                     # (OH, LANES)
            o_ref[t] = x_ref[t] + up * dd_ref[0:1, :] + dd_ref[1:2, :]

    args = (x_dense, im, w1_bd, wpw_bd, w2_bd, wt_bd, hc, cc, dd)

    def const_spec(a):
        nd = a.ndim
        return pl.BlockSpec(a.shape, lambda g, _nd=nd: (0,) * _nd)

    in_specs = [pl.BlockSpec((NB, H // 2, LANES), lambda g: (g, 0, 0)),
                pl.BlockSpec((NB, OH, OW * 9 * C), lambda g: (g, 0, 0))]
    in_specs += [const_spec(a) for a in args[2:]]

    out = pl.pallas_call(
        kernel,
        out_shape=jax.ShapeDtypeStruct((N, H // 2, LANES), f32),
        grid_spec=pltpu.PrefetchScalarGridSpec(
            num_scalar_prefetch=0,
            grid=(G,),
            in_specs=in_specs,
            out_specs=pl.BlockSpec((NB, H // 2, LANES), lambda g: (g, 0, 0))),
        # TODO(synk): if H/W/C scale up, tile over H with halo rows and set
        # pltpu.CompilerParams(vmem_limit_bytes=...) against v7x's 64 MiB
        # (32 MiB default scoped), remembering inputs are double-buffered.
        compiler_params=pltpu.CompilerParams(
            dimension_semantics=("parallel",)),
    )(*args)
    return out.reshape(N, H, W, C)


# ------------------------- pure-JAX reference (NCHW) -------------------------
def _bn(x, scale, shift):
    return x * scale[None, :, None, None] + shift[None, :, None, None]


def ref_forward(x, p):
    dn = ('NCHW', 'OIHW', 'NCHW')
    w1 = jnp.transpose(p['w1'], (3, 2, 0, 1))
    w2 = jnp.transpose(p['w2'], (3, 2, 0, 1))

    y = jax.nn.relu(x)
    y = jnp.pad(y, ((0, 0), (0, 0), (1, 1), (1, 1)), mode='reflect')
    y = lax.conv_general_dilated(y, w1, (2, 2), 'VALID', dimension_numbers=dn)
    y = _bn(y, p['bnh_scale'][0], p['bnh_shift'][0])

    for b, d in enumerate((1, 2, 1)):
        r = jax.nn.relu(y)
        r = jnp.pad(r, ((0, 0), (0, 0), (d, d), (d, d)), mode='reflect')
        wdw = jnp.transpose(p['wdw'][b], (2, 0, 1))[:, None]
        r = lax.conv_general_dilated(r, wdw, (1, 1), 'VALID', rhs_dilation=(d, d),
                                     dimension_numbers=dn,
                                     feature_group_count=r.shape[1])
        r = _bn(r, p['bnh_scale'][1 + 2 * b], p['bnh_shift'][1 + 2 * b])
        r = jax.nn.relu(r)
        wpw = jnp.transpose(p['wpw'][b])[:, :, None, None]
        r = lax.conv_general_dilated(r, wpw, (1, 1), 'VALID', dimension_numbers=dn)
        r = _bn(r, p['bnh_scale'][2 + 2 * b], p['bnh_shift'][2 + 2 * b])
        y = y + r

    r = jax.nn.relu(y)
    r = jnp.pad(r, ((0, 0), (0, 0), (1, 1), (1, 1)), mode='reflect')
    r = lax.conv_general_dilated(r, w2, (1, 1), 'VALID', dimension_numbers=dn)
    r = _bn(r, p['bnc_scale'][0], p['bnc_shift'][0])
    r = jax.nn.relu(r)

    t = jnp.einsum('ncij,abcd->ndiajb', r, p['wt'])
    N, D, OH, _, OW, _ = t.shape
    t = t.reshape(N, D, 2 * OH, 2 * OW)
    t = t + p['bt'][0][None, :, None, None]
    t = _bn(t, p['bnc_scale'][1], p['bnc_shift'][1])
    return x + t


if __name__ == "__main__":
    N, C, H, W = 2, 4, 16, 16
    Ch = int(C * 0.5)
    eps = 1e-5

    key = jax.random.PRNGKey(0)
    ks = jax.random.split(key, 16)
    params = dict(
        w1=0.3 * jax.random.normal(ks[0], (3, 3, C, Ch), jnp.float32),
        wdw=0.3 * jax.random.normal(ks[1], (3, 3, 3, Ch), jnp.float32),
        wpw=0.3 * jax.random.normal(ks[2], (3, Ch, Ch), jnp.float32),
        w2=0.3 * jax.random.normal(ks[3], (3, 3, Ch, C), jnp.float32),
        wt=0.3 * jax.random.normal(ks[4], (2, 2, C, C), jnp.float32),
        bt=0.1 * jax.random.normal(ks[5], (1, C), jnp.float32),
    )
    gamma_h = 1.0 + 0.1 * jax.random.normal(ks[6], (7, Ch), jnp.float32)
    beta_h = 0.1 * jax.random.normal(ks[7], (7, Ch), jnp.float32)
    mean_h = 0.1 * jax.random.normal(ks[8], (7, Ch), jnp.float32)
    var_h = 0.5 + jax.random.uniform(ks[9], (7, Ch), jnp.float32)
    params['bnh_scale'] = gamma_h / jnp.sqrt(var_h + eps)
    params['bnh_shift'] = beta_h - mean_h * params['bnh_scale']

    gamma_c = 1.0 + 0.1 * jax.random.normal(ks[10], (2, C), jnp.float32)
    beta_c = 0.1 * jax.random.normal(ks[11], (2, C), jnp.float32)
    mean_c = 0.1 * jax.random.normal(ks[12], (2, C), jnp.float32)
    var_c = 0.5 + jax.random.uniform(ks[13], (2, C), jnp.float32)
    params['bnc_scale'] = gamma_c / jnp.sqrt(var_c + eps)
    params['bnc_shift'] = beta_c - mean_c * params['bnc_scale']

    x_nchw = jax.random.normal(ks[14], (N, C, H, W), jnp.float32)
    x_nhwc = jnp.transpose(x_nchw, (0, 2, 3, 1))

    # images_per_block=1 -> grid=(2,), one image per step (both v7x TCs busy);
    # on single-TC v5e/v6e pass images_per_block=N to fold the batch.
    out_nhwc = residual_hourglass_pallas(x_nhwc, params, images_per_block=1)
    out_nhwc = jax.block_until_ready(out_nhwc)

    ref = ref_forward(x_nchw, params)
    out_nchw = jnp.transpose(out_nhwc, (0, 3, 1, 2))
    # Kernel matmuls use default MXU precision (bf16 inputs, f32 accumulate);
    # tolerance sized accordingly.
    np.testing.assert_allclose(np.asarray(out_nchw), np.asarray(ref),
                               rtol=2e-2, atol=3e-2)
    print("KERNEL_OK")
</pallas_src>

<mosaic_0001>
module attributes {stable_mosaic.version = 11 : i64} {
  func.func @kernel(%arg0: i32, %arg1: memref<1x8x128xf32, #tpu.memory_space<vmem>>, %arg2: memref<1x8x288xf32, #tpu.memory_space<vmem>>, %arg3: memref<288x16xf32, #tpu.memory_space<vmem>>, %arg4: memref<3x16x16xf32, #tpu.memory_space<vmem>>, %arg5: memref<144x32xf32, #tpu.memory_space<vmem>>, %arg6: memref<32x128xf32, #tpu.memory_space<vmem>>, %arg7: memref<41x16xf32, #tpu.memory_space<vmem>>, %arg8: memref<2x32xf32, #tpu.memory_space<vmem>>, %arg9: memref<2x128xf32, #tpu.memory_space<vmem>>, %arg10: memref<1x8x128xf32, #tpu.memory_space<vmem>>) attributes {dimension_semantics = [#tpu.dimension_semantics<parallel>], iteration_bounds = array<i64: 2>, scalar_prefetch = 0 : i64, scratch_operands = 0 : i64, tpu.core_type = #tpu.core_type<tc>, window_params = [{transform_indices = @transform_0, window_bounds = array<i64: 1, 8, 128>}, {transform_indices = @transform_1, window_bounds = array<i64: 1, 8, 288>}, {pipeline_mode = #tpu.pipeline_mode<synchronous>, transform_indices = @transform_2, window_bounds = array<i64: 288, 16>}, {pipeline_mode = #tpu.pipeline_mode<synchronous>, transform_indices = @transform_3, window_bounds = array<i64: 3, 16, 16>}, {pipeline_mode = #tpu.pipeline_mode<synchronous>, transform_indices = @transform_4, window_bounds = array<i64: 144, 32>}, {pipeline_mode = #tpu.pipeline_mode<synchronous>, transform_indices = @transform_5, window_bounds = array<i64: 32, 128>}, {pipeline_mode = #tpu.pipeline_mode<synchronous>, transform_indices = @transform_6, window_bounds = array<i64: 41, 16>}, {pipeline_mode = #tpu.pipeline_mode<synchronous>, transform_indices = @transform_7, window_bounds = array<i64: 2, 32>}, {pipeline_mode = #tpu.pipeline_mode<synchronous>, transform_indices = @transform_8, window_bounds = array<i64: 2, 128>}, {transform_indices = @transform_9, window_bounds = array<i64: 1, 8, 128>}]} {
    %c0 = arith.constant 0 : index
    %c0_0 = arith.constant 0 : index
    %c0_1 = arith.constant 0 : index
    %0 = vector.load %arg2[%c0, %c0_0, %c0_1] : memref<1x8x288xf32, #tpu.memory_space<vmem>>, vector<1x8x288xf32>
    %1 = vector.shape_cast %0 : vector<1x8x288xf32> to vector<8x288xf32>
    %cst = arith.constant 0.000000e+00 : f32
    %2 = vector.broadcast %cst : f32 to vector<8x288xf32>
    %3 = arith.maximumf %1, %2 : vector<8x288xf32>
    %c0_2 = arith.constant 0 : index
    %c0_3 = arith.constant 0 : index
    %4 = vector.load %arg3[%c0_2, %c0_3] : memref<288x16xf32, #tpu.memory_space<vmem>>, vector<288x16xf32>
    %cst_4 = arith.constant dense<0.000000e+00> : vector<8x16xf32>
    %5 = tpu.matmul %3, %4, %cst_4 {dimension_numbers = #tpu.dot_dimension_numbers<[1], [0], [0], [1], [0, 0, 1, 1], [], []>} : vector<8x288xf32>, vector<288x16xf32>, vector<8x16xf32> -> vector<8x16xf32>
    %c0_5 = arith.constant 0 : index
    %c0_6 = arith.constant 0 : index
    %6 = vector.load %arg7[%c0_5, %c0_6] : memref<41x16xf32, #tpu.memory_space<vmem>>, vector<1x16xf32>
    %7 = vector.broadcast %6 : vector<1x16xf32> to vector<8x16xf32>
    %8 = arith.mulf %5, %7 : vector<8x16xf32>
    %c7 = arith.constant 7 : index
    %c0_7 = arith.constant 0 : index
    %9 = vector.load %arg7[%c7, %c0_7] : memref<41x16xf32, #tpu.memory_space<vmem>>, vector<1x16xf32>
    %10 = vector.broadcast %9 : vector<1x16xf32> to vector<8x16xf32>
    %11 = arith.addf %8, %10 : vector<8x16xf32>
    %cst_8 = arith.constant 0.000000e+00 : f32
    %12 = vector.broadcast %cst_8 : f32 to vector<8x16xf32>
    %13 = arith.maximumf %11, %12 : vector<8x16xf32>
    %14 = vector.extract_strided_slice %13 {offsets = [0, 2], sizes = [8, 2], strides = [1, 1]} : vector<8x16xf32> to vector<8x2xf32>
    %15 = vector.extract_strided_slice %13 {offsets = [0, 12], sizes = [8, 2], strides = [1, 1]} : vector<8x16xf32> to vector<8x2xf32>
    %16 = tpu.concatenate %14, %13, %15 in 1 : vector<8x2xf32>, vector<8x16xf32>, vector<8x2xf32> -> vector<8x20xf32>
    %17 = vector.extract_strided_slice %16 {offsets = [1, 0], sizes = [1, 20], strides = [1, 1]} : vector<8x20xf32> to vector<1x20xf32>
    %18 = vector.extract_strided_slice %16 {offsets = [6, 0], sizes = [1, 20], strides = [1, 1]} : vector<8x20xf32> to vector<1x20xf32>
    %19 = tpu.concatenate %17, %16, %18 in 0 : vector<1x20xf32>, vector<8x20xf32>, vector<1x20xf32> -> vector<10x20xf32>
    %cst_9 = arith.constant 0.000000e+00 : f32
    %20 = vector.broadcast %cst_9 : f32 to vector<8x16xf32>
    %21 = vector.extract_strided_slice %19 {offsets = [0, 0], sizes = [8, 16], strides = [1, 1]} : vector<10x20xf32> to vector<8x16xf32>
    %c14 = arith.constant 14 : index
    %c0_10 = arith.constant 0 : index
    %22 = vector.load %arg7[%c14, %c0_10] : memref<41x16xf32, #tpu.memory_space<vmem>>, vector<1x16xf32>
    %23 = vector.broadcast %22 : vector<1x16xf32> to vector<8x16xf32>
    %24 = arith.mulf %21, %23 : vector<8x16xf32>
    %25 = arith.addf %20, %24 : vector<8x16xf32>
    %26 = vector.extract_strided_slice %19 {offsets = [0, 2], sizes = [8, 16], strides = [1, 1]} : vector<10x20xf32> to vector<8x16xf32>
    %c15 = arith.constant 15 : index
    %c0_11 = arith.constant 0 : index
    %27 = vector.load %arg7[%c15, %c0_11] : memref<41x16xf32, #tpu.memory_space<vmem>>, vector<1x16xf32>
    %28 = vector.broadcast %27 : vector<1x16xf32> to vector<8x16xf32>
    %29 = arith.mulf %26, %28 : vector<8x16xf32>
    %30 = arith.addf %25, %29 : vector<8x16xf32>
    %31 = vector.extract_strided_slice %19 {offsets = [0, 4], sizes = [8, 16], strides = [1, 1]} : vector<10x20xf32> to vector<8x16xf32>
    %c16 = arith.constant 16 : index
    %c0_12 = arith.constant 0 : index
    %32 = vector.load %arg7[%c16, %c0_12] : memref<41x16xf32, #tpu.memory_space<vmem>>, vector<1x16xf32>
    %33 = vector.broadcast %32 : vector<1x16xf32> to vector<8x16xf32>
    %34 = arith.mulf %31, %33 : vector<8x16xf32>
    %35 = arith.addf %30, %34 : vector<8x16xf32>
    %36 = vector.extract_strided_slice %19 {offsets = [1, 0], sizes = [8, 16], strides = [1, 1]} : vector<10x20xf32> to vector<8x16xf32>
    %c17 = arith.constant 17 : index
    %c0_13 = arith.constant 0 : index
    %37 = vector.load %arg7[%c17, %c0_13] : memref<41x16xf32, #tpu.memory_space<vmem>>, vector<1x16xf32>
    %38 = vector.broadcast %37 : vector<1x16xf32> to vector<8x16xf32>
    %39 = arith.mulf %36, %38 : vector<8x16xf32>
    %40 = arith.addf %35, %39 : vector<8x16xf32>
    %41 = vector.extract_strided_slice %19 {offsets = [1, 2], sizes = [8, 16], strides = [1, 1]} : vector<10x20xf32> to vector<8x16xf32>
    %c18 = arith.constant 18 : index
    %c0_14 = arith.constant 0 : index
    %42 = vector.load %arg7[%c18, %c0_14] : memref<41x16xf32, #tpu.memory_space<vmem>>, vector<1x16xf32>
    %43 = vector.broadcast %42 : vector<1x16xf32> to vector<8x16xf32>
    %44 = arith.mulf %41, %43 : vector<8x16xf32>
    %45 = arith.addf %40, %44 : vector<8x16xf32>
    %46 = vector.extract_strided_slice %19 {offsets = [1, 4], sizes = [8, 16], strides = [1, 1]} : vector<10x20xf32> to vector<8x16xf32>
    %c19 = arith.constant 19 : index
    %c0_15 = arith.constant 0 : index
    %47 = vector.load %arg7[%c19, %c0_15] : memref<41x16xf32, #tpu.memory_space<vmem>>, vector<1x16xf32>
    %48 = vector.broadcast %47 : vector<1x16xf32> to vector<8x16xf32>
    %49 = arith.mulf %46, %48 : vector<8x16xf32>
    %50 = arith.addf %45, %49 : vector<8x16xf32>
    %51 = vector.extract_strided_slice %19 {offsets = [2, 0], sizes = [8, 16], strides = [1, 1]} : vector<10x20xf32> to vector<8x16xf32>
    %c20 = arith.constant 20 : index
    %c0_16 = arith.constant 0 : index
    %52 = vector.load %arg7[%c20, %c0_16] : memref<41x16xf32, #tpu.memory_space<vmem>>, vector<1x16xf32>
    %53 = vector.broadcast %52 : vector<1x16xf32> to vector<8x16xf32>
    %54 = arith.mulf %51, %53 : vector<8x16xf32>
    %55 = arith.addf %50, %54 : vector<8x16xf32>
    %56 = vector.extract_strided_slice %19 {offsets = [2, 2], sizes = [8, 16], strides = [1, 1]} : vector<10x20xf32> to vector<8x16xf32>
    %c21 = arith.constant 21 : index
    %c0_17 = arith.constant 0 : index
    %57 = vector.load %arg7[%c21, %c0_17] : memref<41x16xf32, #tpu.memory_space<vmem>>, vector<1x16xf32>
    %58 = vector.broadcast %57 : vector<1x16xf32> to vector<8x16xf32>
    %59 = arith.mulf %56, %58 : vector<8x16xf32>
    %60 = arith.addf %55, %59 : vector<8x16xf32>
    %61 = vector.extract_strided_slice %19 {offsets = [2, 4], sizes = [8, 16], strides = [1, 1]} : vector<10x20xf32> to vector<8x16xf32>
    %c22 = arith.constant 22 : index
    %c0_18 = arith.constant 0 : index
    %62 = vector.load %arg7[%c22, %c0_18] : memref<41x16xf32, #tpu.memory_space<vmem>>, vector<1x16xf32>
    %63 = vector.broadcast %62 : vector<1x16xf32> to vector<8x16xf32>
    %64 = arith.mulf %61, %63 : vector<8x16xf32>
    %65 = arith.addf %60, %64 : vector<8x16xf32>
    %c1 = arith.constant 1 : index
    %c0_19 = arith.constant 0 : index
    %66 = vector.load %arg7[%c1, %c0_19] : memref<41x16xf32, #tpu.memory_space<vmem>>, vector<1x16xf32>
    %67 = vector.broadcast %66 : vector<1x16xf32> to vector<8x16xf32>
    %68 = arith.mulf %65, %67 : vector<8x16xf32>
    %c8 = arith.constant 8 : index
    %c0_20 = arith.constant 0 : index
    %69 = vector.load %arg7[%c8, %c0_20] : memref<41x16xf32, #tpu.memory_space<vmem>>, vector<1x16xf32>
    %70 = vector.broadcast %69 : vector<1x16xf32> to vector<8x16xf32>
    %71 = arith.addf %68, %70 : vector<8x16xf32>
    %cst_21 = arith.constant 0.000000e+00 : f32
    %72 = vector.broadcast %cst_21 : f32 to vector<8x16xf32>
    %73 = arith.maximumf %71, %72 : vector<8x16xf32>
    %c0_22 = arith.constant 0 : index
    %c0_23 = arith.constant 0 : index
    %c0_24 = arith.constant 0 : index
    %74 = vector.load %arg4[%c0_22, %c0_23, %c0_24] : memref<3x16x16xf32, #tpu.memory_space<vmem>>, vector<1x16x16xf32>
    %75 = vector.shape_cast %74 : vector<1x16x16xf32> to vector<16x16xf32>
    %cst_25 = arith.constant dense<0.000000e+00> : vector<8x16xf32>
    %76 = tpu.matmul %73, %75, %cst_25 {dimension_numbers = #tpu.dot_dimension_numbers<[1], [0], [0], [1], [0, 0, 1, 1], [], []>} : vector<8x16xf32>, vector<16x16xf32>, vector<8x16xf32> -> vector<8x16xf32>
    %c2 = arith.constant 2 : index
    %c0_26 = arith.constant 0 : index
    %77 = vector.load %arg7[%c2, %c0_26] : memref<41x16xf32, #tpu.memory_space<vmem>>, vector<1x16xf32>
    %78 = vector.broadcast %77 : vector<1x16xf32> to vector<8x16xf32>
    %79 = arith.mulf %76, %78 : vector<8x16xf32>
    %c9 = arith.constant 9 : index
    %c0_27 = arith.constant 0 : index
    %80 = vector.load %arg7[%c9, %c0_27] : memref<41x16xf32, #tpu.memory_space<vmem>>, vector<1x16xf32>
    %81 = vector.broadcast %80 : vector<1x16xf32> to vector<8x16xf32>
    %82 = arith.addf %79, %81 : vector<8x16xf32>
    %83 = arith.addf %11, %82 : vector<8x16xf32>
    %cst_28 = arith.constant 0.000000e+00 : f32
    %84 = vector.broadcast %cst_28 : f32 to vector<8x16xf32>
    %85 = arith.maximumf %83, %84 : vector<8x16xf32>
    %86 = vector.extract_strided_slice %85 {offsets = [0, 4], sizes = [8, 2], strides = [1, 1]} : vector<8x16xf32> to vector<8x2xf32>
    %87 = vector.extract_strided_slice %85 {offsets = [0, 2], sizes = [8, 2], strides = [1, 1]} : vector<8x16xf32> to vector<8x2xf32>
    %88 = vector.extract_strided_slice %85 {offsets = [0, 12], sizes = [8, 2], strides = [1, 1]} : vector<8x16xf32> to vector<8x2xf32>
    %89 = vector.extract_strided_slice %85 {offsets = [0, 10], sizes = [8, 2], strides = [1, 1]} : vector<8x16xf32> to vector<8x2xf32>
    %90 = tpu.concatenate %86, %87, %85, %88, %89 in 1 : vector<8x2xf32>, vector<8x2xf32>, vector<8x16xf32>, vector<8x2xf32>, vector<8x2xf32> -> vector<8x24xf32>
    %91 = vector.extract_strided_slice %90 {offsets = [2, 0], sizes = [1, 24], strides = [1, 1]} : vector<8x24xf32> to vector<1x24xf32>
    %92 = vector.extract_strided_slice %90 {offsets = [1, 0], sizes = [1, 24], strides = [1, 1]} : vector<8x24xf32> to vector<1x24xf32>
    %93 = vector.extract_strided_slice %90 {offsets = [6, 0], sizes = [1, 24], strides = [1, 1]} : vector<8x24xf32> to vector<1x24xf32>
    %94 = vector.extract_strided_slice %90 {offsets = [5, 0], sizes = [1, 24], strides = [1, 1]} : vector<8x24xf32> to vector<1x24xf32>
    %95 = tpu.concatenate %91, %92, %90, %93, %94 in 0 : vector<1x24xf32>, vector<1x24xf32>, vector<8x24xf32>, vector<1x24xf32>, vector<1x24xf32> -> vector<12x24xf32>
    %cst_29 = arith.constant 0.000000e+00 : f32
    %96 = vector.broadcast %cst_29 : f32 to vector<8x16xf32>
    %97 = vector.extract_strided_slice %95 {offsets = [0, 0], sizes = [8, 16], strides = [1, 1]} : vector<12x24xf32> to vector<8x16xf32>
    %c23 = arith.constant 23 : index
    %c0_30 = arith.constant 0 : index
    %98 = vector.load %arg7[%c23, %c0_30] : memref<41x16xf32, #tpu.memory_space<vmem>>, vector<1x16xf32>
    %99 = vector.broadcast %98 : vector<1x16xf32> to vector<8x16xf32>
    %100 = arith.mulf %97, %99 : vector<8x16xf32>
    %101 = arith.addf %96, %100 : vector<8x16xf32>
    %102 = vector.extract_strided_slice %95 {offsets = [0, 4], sizes = [8, 16], strides = [1, 1]} : vector<12x24xf32> to vector<8x16xf32>
    %c24 = arith.constant 24 : index
    %c0_31 = arith.constant 0 : index
    %103 = vector.load %arg7[%c24, %c0_31] : memref<41x16xf32, #tpu.memory_space<vmem>>, vector<1x16xf32>
    %104 = vector.broadcast %103 : vector<1x16xf32> to vector<8x16xf32>
    %105 = arith.mulf %102, %104 : vector<8x16xf32>
    %106 = arith.addf %101, %105 : vector<8x16xf32>
    %107 = vector.extract_strided_slice %95 {offsets = [0, 8], sizes = [8, 16], strides = [1, 1]} : vector<12x24xf32> to vector<8x16xf32>
    %c25 = arith.constant 25 : index
    %c0_32 = arith.constant 0 : index
    %108 = vector.load %arg7[%c25, %c0_32] : memref<41x16xf32, #tpu.memory_space<vmem>>, vector<1x16xf32>
    %109 = vector.broadcast %108 : vector<1x16xf32> to vector<8x16xf32>
    %110 = arith.mulf %107, %109 : vector<8x16xf32>
    %111 = arith.addf %106, %110 : vector<8x16xf32>
    %112 = vector.extract_strided_slice %95 {offsets = [2, 0], sizes = [8, 16], strides = [1, 1]} : vector<12x24xf32> to vector<8x16xf32>
    %c26 = arith.constant 26 : index
    %c0_33 = arith.constant 0 : index
    %113 = vector.load %arg7[%c26, %c0_33] : memref<41x16xf32, #tpu.memory_space<vmem>>, vector<1x16xf32>
    %114 = vector.broadcast %113 : vector<1x16xf32> to vector<8x16xf32>
    %115 = arith.mulf %112, %114 : vector<8x16xf32>
    %116 = arith.addf %111, %115 : vector<8x16xf32>
    %117 = vector.extract_strided_slice %95 {offsets = [2, 4], sizes = [8, 16], strides = [1, 1]} : vector<12x24xf32> to vector<8x16xf32>
    %c27 = arith.constant 27 : index
    %c0_34 = arith.constant 0 : index
    %118 = vector.load %arg7[%c27, %c0_34] : memref<41x16xf32, #tpu.memory_space<vmem>>, vector<1x16xf32>
    %119 = vector.broadcast %118 : vector<1x16xf32> to vector<8x16xf32>
    %120 = arith.mulf %117, %119 : vector<8x16xf32>
    %121 = arith.addf %116, %120 : vector<8x16xf32>
    %122 = vector.extract_strided_slice %95 {offsets = [2, 8], sizes = [8, 16], strides = [1, 1]} : vector<12x24xf32> to vector<8x16xf32>
    %c28 = arith.constant 28 : index
    %c0_35 = arith.constant 0 : index
    %123 = vector.load %arg7[%c28, %c0_35] : memref<41x16xf32, #tpu.memory_space<vmem>>, vector<1x16xf32>
    %124 = vector.broadcast %123 : vector<1x16xf32> to vector<8x16xf32>
    %125 = arith.mulf %122, %124 : vector<8x16xf32>
    %126 = arith.addf %121, %125 : vector<8x16xf32>
    %127 = vector.extract_strided_slice %95 {offsets = [4, 0], sizes = [8, 16], strides = [1, 1]} : vector<12x24xf32> to vector<8x16xf32>
    %c29 = arith.constant 29 : index
    %c0_36 = arith.constant 0 : index
    %128 = vector.load %arg7[%c29, %c0_36] : memref<41x16xf32, #tpu.memory_space<vmem>>, vector<1x16xf32>
    %129 = vector.broadcast %128 : vector<1x16xf32> to vector<8x16xf32>
    %130 = arith.mulf %127, %129 : vector<8x16xf32>
    %131 = arith.addf %126, %130 : vector<8x16xf32>
    %132 = vector.extract_strided_slice %95 {offsets = [4, 4], sizes = [8, 16], strides = [1, 1]} : vector<12x24xf32> to vector<8x16xf32>
    %c30 = arith.constant 30 : index
    %c0_37 = arith.constant 0 : index
    %133 = vector.load %arg7[%c30, %c0_37] : memref<41x16xf32, #tpu.memory_space<vmem>>, vector<1x16xf32>
    %134 = vector.broadcast %133 : vector<1x16xf32> to vector<8x16xf32>
    %135 = arith.mulf %132, %134 : vector<8x16xf32>
    %136 = arith.addf %131, %135 : vector<8x16xf32>
    %137 = vector.extract_strided_slice %95 {offsets = [4, 8], sizes = [8, 16], strides = [1, 1]} : vector<12x24xf32> to vector<8x16xf32>
    %c31 = arith.constant 31 : index
    %c0_38 = arith.constant 0 : index
    %138 = vector.load %arg7[%c31, %c0_38] : memref<41x16xf32, #tpu.memory_space<vmem>>, vector<1x16xf32>
    %139 = vector.broadcast %138 : vector<1x16xf32> to vector<8x16xf32>
    %140 = arith.mulf %137, %139 : vector<8x16xf32>
    %141 = arith.addf %136, %140 : vector<8x16xf32>
    %c3 = arith.constant 3 : index
    %c0_39 = arith.constant 0 : index
    %142 = vector.load %arg7[%c3, %c0_39] : memref<41x16xf32, #tpu.memory_space<vmem>>, vector<1x16xf32>
    %143 = vector.broadcast %142 : vector<1x16xf32> to vector<8x16xf32>
    %144 = arith.mulf %141, %143 : vector<8x16xf32>
    %c10 = arith.constant 10 : index
    %c0_40 = arith.constant 0 : index
    %145 = vector.load %arg7[%c10, %c0_40] : memref<41x16xf32, #tpu.memory_space<vmem>>, vector<1x16xf32>
    %146 = vector.broadcast %145 : vector<1x16xf32> to vector<8x16xf32>
    %147 = arith.addf %144, %146 : vector<8x16xf32>
    %cst_41 = arith.constant 0.000000e+00 : f32
    %148 = vector.broadcast %cst_41 : f32 to vector<8x16xf32>
    %149 = arith.maximumf %147, %148 : vector<8x16xf32>
    %c1_42 = arith.constant 1 : index
    %c0_43 = arith.constant 0 : index
    %c0_44 = arith.constant 0 : index
    %150 = vector.load %arg4[%c1_42, %c0_43, %c0_44] : memref<3x16x16xf32, #tpu.memory_space<vmem>>, vector<1x16x16xf32>
    %151 = vector.shape_cast %150 : vector<1x16x16xf32> to vector<16x16xf32>
    %cst_45 = arith.constant dense<0.000000e+00> : vector<8x16xf32>
    %152 = tpu.matmul %149, %151, %cst_45 {dimension_numbers = #tpu.dot_dimension_numbers<[1], [0], [0], [1], [0, 0, 1, 1], [], []>} : vector<8x16xf32>, vector<16x16xf32>, vector<8x16xf32> -> vector<8x16xf32>
    %c4 = arith.constant 4 : index
    %c0_46 = arith.constant 0 : index
    %153 = vector.load %arg7[%c4, %c0_46] : memref<41x16xf32, #tpu.memory_space<vmem>>, vector<1x16xf32>
    %154 = vector.broadcast %153 : vector<1x16xf32> to vector<8x16xf32>
    %155 = arith.mulf %152, %154 : vector<8x16xf32>
    %c11 = arith.constant 11 : index
    %c0_47 = arith.constant 0 : index
    %156 = vector.load %arg7[%c11, %c0_47] : memref<41x16xf32, #tpu.memory_space<vmem>>, vector<1x16xf32>
    %157 = vector.broadcast %156 : vector<1x16xf32> to vector<8x16xf32>
    %158 = arith.addf %155, %157 : vector<8x16xf32>
    %159 = arith.addf %83, %158 : vector<8x16xf32>
    %cst_48 = arith.constant 0.000000e+00 : f32
    %160 = vector.broadcast %cst_48 : f32 to vector<8x16xf32>
    %161 = arith.maximumf %159, %160 : vector<8x16xf32>
    %162 = vector.extract_strided_slice %161 {offsets = [0, 2], sizes = [8, 2], strides = [1, 1]} : vector<8x16xf32> to vector<8x2xf32>
    %163 = vector.extract_strided_slice %161 {offsets = [0, 12], sizes = [8, 2], strides = [1, 1]} : vector<8x16xf32> to vector<8x2xf32>
    %164 = tpu.concatenate %162, %161, %163 in 1 : vector<8x2xf32>, vector<8x16xf32>, vector<8x2xf32> -> vector<8x20xf32>
    %165 = vector.extract_strided_slice %164 {offsets = [1, 0], sizes = [1, 20], strides = [1, 1]} : vector<8x20xf32> to vector<1x20xf32>
    %166 = vector.extract_strided_slice %164 {offsets = [6, 0], sizes = [1, 20], strides = [1, 1]} : vector<8x20xf32> to vector<1x20xf32>
    %167 = tpu.concatenate %165, %164, %166 in 0 : vector<1x20xf32>, vector<8x20xf32>, vector<1x20xf32> -> vector<10x20xf32>
    %cst_49 = arith.constant 0.000000e+00 : f32
    %168 = vector.broadcast %cst_49 : f32 to vector<8x16xf32>
    %169 = vector.extract_strided_slice %167 {offsets = [0, 0], sizes = [8, 16], strides = [1, 1]} : vector<10x20xf32> to vector<8x16xf32>
    %c32 = arith.constant 32 : index
    %c0_50 = arith.constant 0 : index
    %170 = vector.load %arg7[%c32, %c0_50] : memref<41x16xf32, #tpu.memory_space<vmem>>, vector<1x16xf32>
    %171 = vector.broadcast %170 : vector<1x16xf32> to vector<8x16xf32>
    %172 = arith.mulf %169, %171 : vector<8x16xf32>
    %173 = arith.addf %168, %172 : vector<8x16xf32>
    %174 = vector.extract_strided_slice %167 {offsets = [0, 2], sizes = [8, 16], strides = [1, 1]} : vector<10x20xf32> to vector<8x16xf32>
    %c33 = arith.constant 33 : index
    %c0_51 = arith.constant 0 : index
    %175 = vector.load %arg7[%c33, %c0_51] : memref<41x16xf32, #tpu.memory_space<vmem>>, vector<1x16xf32>
    %176 = vector.broadcast %175 : vector<1x16xf32> to vector<8x16xf32>
    %177 = arith.mulf %174, %176 : vector<8x16xf32>
    %178 = arith.addf %173, %177 : vector<8x16xf32>
    %179 = vector.extract_strided_slice %167 {offsets = [0, 4], sizes = [8, 16], strides = [1, 1]} : vector<10x20xf32> to vector<8x16xf32>
    %c34 = arith.constant 34 : index
    %c0_52 = arith.constant 0 : index
    %180 = vector.load %arg7[%c34, %c0_52] : memref<41x16xf32, #tpu.memory_space<vmem>>, vector<1x16xf32>
    %181 = vector.broadcast %180 : vector<1x16xf32> to vector<8x16xf32>
    %182 = arith.mulf %179, %181 : vector<8x16xf32>
    %183 = arith.addf %178, %182 : vector<8x16xf32>
    %184 = vector.extract_strided_slice %167 {offsets = [1, 0], sizes = [8, 16], strides = [1, 1]} : vector<10x20xf32> to vector<8x16xf32>
    %c35 = arith.constant 35 : index
    %c0_53 = arith.constant 0 : index
    %185 = vector.load %arg7[%c35, %c0_53] : memref<41x16xf32, #tpu.memory_space<vmem>>, vector<1x16xf32>
    %186 = vector.broadcast %185 : vector<1x16xf32> to vector<8x16xf32>
    %187 = arith.mulf %184, %186 : vector<8x16xf32>
    %188 = arith.addf %183, %187 : vector<8x16xf32>
    %189 = vector.extract_strided_slice %167 {offsets = [1, 2], sizes = [8, 16], strides = [1, 1]} : vector<10x20xf32> to vector<8x16xf32>
    %c36 = arith.constant 36 : index
    %c0_54 = arith.constant 0 : index
    %190 = vector.load %arg7[%c36, %c0_54] : memref<41x16xf32, #tpu.memory_space<vmem>>, vector<1x16xf32>
    %191 = vector.broadcast %190 : vector<1x16xf32> to vector<8x16xf32>
    %192 = arith.mulf %189, %191 : vector<8x16xf32>
    %193 = arith.addf %188, %192 : vector<8x16xf32>
    %194 = vector.extract_strided_slice %167 {offsets = [1, 4], sizes = [8, 16], strides = [1, 1]} : vector<10x20xf32> to vector<8x16xf32>
    %c37 = arith.constant 37 : index
    %c0_55 = arith.constant 0 : index
    %195 = vector.load %arg7[%c37, %c0_55] : memref<41x16xf32, #tpu.memory_space<vmem>>, vector<1x16xf32>
    %196 = vector.broadcast %195 : vector<1x16xf32> to vector<8x16xf32>
    %197 = arith.mulf %194, %196 : vector<8x16xf32>
    %198 = arith.addf %193, %197 : vector<8x16xf32>
    %199 = vector.extract_strided_slice %167 {offsets = [2, 0], sizes = [8, 16], strides = [1, 1]} : vector<10x20xf32> to vector<8x16xf32>
    %c38 = arith.constant 38 : index
    %c0_56 = arith.constant 0 : index
    %200 = vector.load %arg7[%c38, %c0_56] : memref<41x16xf32, #tpu.memory_space<vmem>>, vector<1x16xf32>
    %201 = vector.broadcast %200 : vector<1x16xf32> to vector<8x16xf32>
    %202 = arith.mulf %199, %201 : vector<8x16xf32>
    %203 = arith.addf %198, %202 : vector<8x16xf32>
    %204 = vector.extract_strided_slice %167 {offsets = [2, 2], sizes = [8, 16], strides = [1, 1]} : vector<10x20xf32> to vector<8x16xf32>
    %c39 = arith.constant 39 : index
    %c0_57 = arith.constant 0 : index
    %205 = vector.load %arg7[%c39, %c0_57] : memref<41x16xf32, #tpu.memory_space<vmem>>, vector<1x16xf32>
    %206 = vector.broadcast %205 : vector<1x16xf32> to vector<8x16xf32>
    %207 = arith.mulf %204, %206 : vector<8x16xf32>
    %208 = arith.addf %203, %207 : vector<8x16xf32>
    %209 = vector.extract_strided_slice %167 {offsets = [2, 4], sizes = [8, 16], strides = [1, 1]} : vector<10x20xf32> to vector<8x16xf32>
    %c40 = arith.constant 40 : index
    %c0_58 = arith.constant 0 : index
    %210 = vector.load %arg7[%c40, %c0_58] : memref<41x16xf32, #tpu.memory_space<vmem>>, vector<1x16xf32>
    %211 = vector.broadcast %210 : vector<1x16xf32> to vector<8x16xf32>
    %212 = arith.mulf %209, %211 : vector<8x16xf32>
    %213 = arith.addf %208, %212 : vector<8x16xf32>
    %c5 = arith.constant 5 : index
    %c0_59 = arith.constant 0 : index
    %214 = vector.load %arg7[%c5, %c0_59] : memref<41x16xf32, #tpu.memory_space<vmem>>, vector<1x16xf32>
    %215 = vector.broadcast %214 : vector<1x16xf32> to vector<8x16xf32>
    %216 = arith.mulf %213, %215 : vector<8x16xf32>
    %c12 = arith.constant 12 : index
    %c0_60 = arith.constant 0 : index
    %217 = vector.load %arg7[%c12, %c0_60] : memref<41x16xf32, #tpu.memory_space<vmem>>, vector<1x16xf32>
    %218 = vector.broadcast %217 : vector<1x16xf32> to vector<8x16xf32>
    %219 = arith.addf %216, %218 : vector<8x16xf32>
    %cst_61 = arith.constant 0.000000e+00 : f32
    %220 = vector.broadcast %cst_61 : f32 to vector<8x16xf32>
    %221 = arith.maximumf %219, %220 : vector<8x16xf32>
    %c2_62 = arith.constant 2 : index
    %c0_63 = arith.constant 0 : index
    %c0_64 = arith.constant 0 : index
    %222 = vector.load %arg4[%c2_62, %c0_63, %c0_64] : memref<3x16x16xf32, #tpu.memory_space<vmem>>, vector<1x16x16xf32>
    %223 = vector.shape_cast %222 : vector<1x16x16xf32> to vector<16x16xf32>
    %cst_65 = arith.constant dense<0.000000e+00> : vector<8x16xf32>
    %224 = tpu.matmul %221, %223, %cst_65 {dimension_numbers = #tpu.dot_dimension_numbers<[1], [0], [0], [1], [0, 0, 1, 1], [], []>} : vector<8x16xf32>, vector<16x16xf32>, vector<8x16xf32> -> vector<8x16xf32>
    %c6 = arith.constant 6 : index
    %c0_66 = arith.constant 0 : index
    %225 = vector.load %arg7[%c6, %c0_66] : memref<41x16xf32, #tpu.memory_space<vmem>>, vector<1x16xf32>
    %226 = vector.broadcast %225 : vector<1x16xf32> to vector<8x16xf32>
    %227 = arith.mulf %224, %226 : vector<8x16xf32>
    %c13 = arith.constant 13 : index
    %c0_67 = arith.constant 0 : index
    %228 = vector.load %arg7[%c13, %c0_67] : memref<41x16xf32, #tpu.memory_space<vmem>>, vector<1x16xf32>
    %229 = vector.broadcast %228 : vector<1x16xf32> to vector<8x16xf32>
    %230 = arith.addf %227, %229 : vector<8x16xf32>
    %231 = arith.addf %159, %230 : vector<8x16xf32>
    %cst_68 = arith.constant 0.000000e+00 : f32
    %232 = vector.broadcast %cst_68 : f32 to vector<8x16xf32>
    %233 = arith.maximumf %231, %232 : vector<8x16xf32>
    %234 = vector.extract_strided_slice %233 {offsets = [0, 2], sizes = [8, 2], strides = [1, 1]} : vector<8x16xf32> to vector<8x2xf32>
    %235 = vector.extract_strided_slice %233 {offsets = [0, 12], sizes = [8, 2], strides = [1, 1]} : vector<8x16xf32> to vector<8x2xf32>
    %236 = tpu.concatenate %234, %233, %235 in 1 : vector<8x2xf32>, vector<8x16xf32>, vector<8x2xf32> -> vector<8x20xf32>
    %237 = vector.extract_strided_slice %236 {offsets = [1, 0], sizes = [1, 20], strides = [1, 1]} : vector<8x20xf32> to vector<1x20xf32>
    %238 = vector.extract_strided_slice %236 {offsets = [6, 0], sizes = [1, 20], strides = [1, 1]} : vector<8x20xf32> to vector<1x20xf32>
    %239 = tpu.concatenate %237, %236, %238 in 0 : vector<1x20xf32>, vector<8x20xf32>, vector<1x20xf32> -> vector<10x20xf32>
    %240 = vector.extract_strided_slice %239 {offsets = [0, 0], sizes = [8, 16], strides = [1, 1]} : vector<10x20xf32> to vector<8x16xf32>
    %241 = vector.extract_strided_slice %239 {offsets = [0, 2], sizes = [8, 16], strides = [1, 1]} : vector<10x20xf32> to vector<8x16xf32>
    %242 = vector.extract_strided_slice %239 {offsets = [0, 4], sizes = [8, 16], strides = [1, 1]} : vector<10x20xf32> to vector<8x16xf32>
    %243 = vector.extract_strided_slice %239 {offsets = [1, 0], sizes = [8, 16], strides = [1, 1]} : vector<10x20xf32> to vector<8x16xf32>
    %244 = vector.extract_strided_slice %239 {offsets = [1, 2], sizes = [8, 16], strides = [1, 1]} : vector<10x20xf32> to vector<8x16xf32>
    %245 = vector.extract_strided_slice %239 {offsets = [1, 4], sizes = [8, 16], strides = [1, 1]} : vector<10x20xf32> to vector<8x16xf32>
    %246 = vector.extract_strided_slice %239 {offsets = [2, 0], sizes = [8, 16], strides = [1, 1]} : vector<10x20xf32> to vector<8x16xf32>
    %247 = vector.extract_strided_slice %239 {offsets = [2, 2], sizes = [8, 16], strides = [1, 1]} : vector<10x20xf32> to vector<8x16xf32>
    %248 = vector.extract_strided_slice %239 {offsets = [2, 4], sizes = [8, 16], strides = [1, 1]} : vector<10x20xf32> to vector<8x16xf32>
    %249 = tpu.concatenate %240, %241, %242, %243, %244, %245, %246, %247, %248 in 1 : vector<8x16xf32>, vector<8x16xf32>, vector<8x16xf32>, vector<8x16xf32>, vector<8x16xf32>, vector<8x16xf32>, vector<8x16xf32>, vector<8x16xf32>, vector<8x16xf32> -> vector<8x144xf32>
    %c0_69 = arith.constant 0 : index
    %c0_70 = arith.constant 0 : index
    %250 = vector.load %arg5[%c0_69, %c0_70] : memref<144x32xf32, #tpu.memory_space<vmem>>, vector<144x32xf32>
    %cst_71 = arith.constant dense<0.000000e+00> : vector<8x32xf32>
    %251 = tpu.matmul %249, %250, %cst_71 {dimension_numbers = #tpu.dot_dimension_numbers<[1], [0], [0], [1], [0, 0, 1, 1], [], []>} : vector<8x144xf32>, vector<144x32xf32>, vector<8x32xf32> -> vector<8x32xf32>
    %c0_72 = arith.constant 0 : index
    %c0_73 = arith.constant 0 : index
    %252 = vector.load %arg8[%c0_72, %c0_73] : memref<2x32xf32, #tpu.memory_space<vmem>>, vector<1x32xf32>
    %253 = vector.broadcast %252 : vector<1x32xf32> to vector<8x32xf32>
    %254 = arith.mulf %251, %253 : vector<8x32xf32>
    %c1_74 = arith.constant 1 : index
    %c0_75 = arith.constant 0 : index
    %255 = vector.load %arg8[%c1_74, %c0_75] : memref<2x32xf32, #tpu.memory_space<vmem>>, vector<1x32xf32>
    %256 = vector.broadcast %255 : vector<1x32xf32> to vector<8x32xf32>
    %257 = arith.addf %254, %256 : vector<8x32xf32>
    %cst_76 = arith.constant 0.000000e+00 : f32
    %258 = vector.broadcast %cst_76 : f32 to vector<8x32xf32>
    %259 = arith.maximumf %257, %258 : vector<8x32xf32>
    %c0_77 = arith.constant 0 : index
    %c0_78 = arith.constant 0 : index
    %260 = vector.load %arg6[%c0_77, %c0_78] : memref<32x128xf32, #tpu.memory_space<vmem>>, vector<32x128xf32>
    %cst_79 = arith.constant dense<0.000000e+00> : vector<8x128xf32>
    %261 = tpu.matmul %259, %260, %cst_79 {dimension_numbers = #tpu.dot_dimension_numbers<[1], [0], [0], [1], [0, 0, 1, 1], [], []>} : vector<8x32xf32>, vector<32x128xf32>, vector<8x128xf32> -> vector<8x128xf32>
    %c0_80 = arith.constant 0 : index
    %c0_81 = arith.constant 0 : index
    %c0_82 = arith.constant 0 : index
    %262 = vector.load %arg1[%c0_80, %c0_81, %c0_82] : memref<1x8x128xf32, #tpu.memory_space<vmem>>, vector<1x8x128xf32>
    %263 = vector.shape_cast %262 : vector<1x8x128xf32> to vector<8x128xf32>
    %c0_83 = arith.constant 0 : index
    %c0_84 = arith.constant 0 : index
    %264 = vector.load %arg9[%c0_83, %c0_84] : memref<2x128xf32, #tpu.memory_space<vmem>>, vector<1x128xf32>
    %265 = vector.broadcast %264 : vector<1x128xf32> to vector<8x128xf32>
    %266 = arith.mulf %261, %265 : vector<8x128xf32>
    %267 = arith.addf %263, %266 : vector<8x128xf32>
    %c1_85 = arith.constant 1 : index
    %c0_86 = arith.constant 0 : index
    %268 = vector.load %arg9[%c1_85, %c0_86] : memref<2x128xf32, #tpu.memory_space<vmem>>, vector<1x128xf32>
    %269 = vector.broadcast %268 : vector<1x128xf32> to vector<8x128xf32>
    %270 = arith.addf %267, %269 : vector<8x128xf32>
    %c0_87 = arith.constant 0 : index
    %c0_88 = arith.constant 0 : index
    %c0_89 = arith.constant 0 : index
    %271 = vector.load %arg10[%c0_87, %c0_88, %c0_89] : memref<1x8x128xf32, #tpu.memory_space<vmem>>, vector<1x8x128xf32>
    %272 = vector.shape_cast %271 : vector<1x8x128xf32> to vector<8x128xf32>
    %273 = vector.shape_cast %270 : vector<8x128xf32> to vector<1x8x128xf32>
    tpu.vector_store %arg10[%c0_87, %c0_88, %c0_89], %273 {strides = array<i32>} : memref<1x8x128xf32, #tpu.memory_space<vmem>>, vector<1x8x128xf32>,
    return
  }
  func.func @transform_0(%arg0: i32) -> (i32, i32, i32) {
    %c0_i32 = arith.constant 0 : i32
    %c0_i32_0 = arith.constant 0 : i32
    %c0_i32_1 = arith.constant 0 : i32
    return %arg0, %c0_i32, %c0_i32_0 : i32, i32, i32
  }
  func.func @transform_1(%arg0: i32) -> (i32, i32, i32) {
    %c0_i32 = arith.constant 0 : i32
    %c0_i32_0 = arith.constant 0 : i32
    %c0_i32_1 = arith.constant 0 : i32
    return %arg0, %c0_i32, %c0_i32_0 : i32, i32, i32
  }
  func.func @transform_2(%arg0: i32) -> (i32, i32) {
    %c0_i32 = arith.constant 0 : i32
    %c0_i32_0 = arith.constant 0 : i32
    %c0_i32_1 = arith.constant 0 : i32
    return %c0_i32, %c0_i32_0 : i32, i32
  }
  func.func @transform_3(%arg0: i32) -> (i32, i32, i32) {
    %c0_i32 = arith.constant 0 : i32
    %c0_i32_0 = arith.constant 0 : i32
    %c0_i32_1 = arith.constant 0 : i32
    %c0_i32_2 = arith.constant 0 : i32
    return %c0_i32, %c0_i32_0, %c0_i32_1 : i32, i32, i32
  }
  func.func @transform_4(%arg0: i32) -> (i32, i32) {
    %c0_i32 = arith.constant 0 : i32
    %c0_i32_0 = arith.constant 0 : i32
    %c0_i32_1 = arith.constant 0 : i32
    return %c0_i32, %c0_i32_0 : i32, i32
  }
  func.func @transform_5(%arg0: i32) -> (i32, i32) {
    %c0_i32 = arith.constant 0 : i32
    %c0_i32_0 = arith.constant 0 : i32
    %c0_i32_1 = arith.constant 0 : i32
    return %c0_i32, %c0_i32_0 : i32, i32
  }
  func.func @transform_6(%arg0: i32) -> (i32, i32) {
    %c0_i32 = arith.constant 0 : i32
    %c0_i32_0 = arith.constant 0 : i32
    %c0_i32_1 = arith.constant 0 : i32
    return %c0_i32, %c0_i32_0 : i32, i32
  }
  func.func @transform_7(%arg0: i32) -> (i32, i32) {
    %c0_i32 = arith.constant 0 : i32
    %c0_i32_0 = arith.constant 0 : i32
    %c0_i32_1 = arith.constant 0 : i32
    return %c0_i32, %c0_i32_0 : i32, i32
  }
  func.func @transform_8(%arg0: i32) -> (i32, i32) {
    %c0_i32 = arith.constant 0 : i32
    %c0_i32_0 = arith.constant 0 : i32
    %c0_i32_1 = arith.constant 0 : i32
    return %c0_i32, %c0_i32_0 : i32, i32
  }
  func.func @transform_9(%arg0: i32) -> (i32, i32, i32) {
    %c0_i32 = arith.constant 0 : i32
    %c0_i32_0 = arith.constant 0 : i32
    %c0_i32_1 = arith.constant 0 : i32
    return %arg0, %c0_i32, %c0_i32_0 : i32, i32, i32
  }
}

</mosaic_0001>

<bundles_post_ra>
// kernel: tpu_custom_call.1
= control target key start
LH: loop header
LB: loop body
LE: loop exit
PB: predicated region body
PF: predicated region fallthrough
CT: control target
= control target key end

     0   :  { %s2633_s0 = inlined_call_operand.vmem [shape: f32[2,8,128], index: 0, kind: input, shape index: {}]   ;;  %s2634_s1 = inlined_call_operand.vmem [shape: f32[2,8,288], index: 1, kind: input, shape index: {}]   ;;  %s2635_s2 = inlined_call_operand.vmem [shape: f32[288,16], index: 2, kind: input, shape index: {}]   ;;  %s2636_s3 = inlined_call_operand.vmem [shape: f32[3,16,16], index: 3, kind: input, shape index: {}]   ;;  %s2637_s4 = inlined_call_operand.vmem [shape: f32[144,32], index: 4, kind: input, shape index: {}]   ;;  %s2638_s5 = inlined_call_operand.vmem [shape: f32[32,128], index: 5, kind: input, shape index: {}]   ;;  %s2639_s6 = inlined_call_operand.vmem [shape: f32[41,16], index: 6, kind: input, shape index: {}]   ;;  %s2640_s7 = inlined_call_operand.vmem [shape: f32[2,32], index: 7, kind: input, shape index: {}]   ;;  %s2641_s8 = inlined_call_operand.vmem [shape: f32[2,128], index: 8, kind: input, shape index: {}]   ;;  %s2642_s9 = inlined_call_operand.hbm [shape: f32[2,8,128], index: 9, kind: output, shape index: {}]  }
   0x1   :  { %2651 = sst [smem:[#allocation5_spill]] %s2634_s1 }
   0x2   :  { %2652 = sst [smem:[#allocation6_spill]] %s2635_s2 }
   0x3   :  { %14 = vsyncpa [#allocation3], 0 }
   0x4   :  { %16 = vsyncpa [#allocation3 + $0x1], 0  ;;  %s2066_s30 = smov 0   ;;  %s2068_s10 = smov 0  }
   0x5   :  { %s2070_s11 = smov 0   ;;  %s2072_s12 = smov 0  }
   0x6 LB: > { %s2087_s13 = sadd.s32 4294967295, %s1996_s12   ;;  %s1716_s14 = sadd.s32 4294967294, %s1996_s12   ;;  %s1996_s12 = sphi %s2072_s12, %s2664_s12   ;;  %s1992_s11 = sphi %s2070_s11, %s2663_s11   ;;  %s1988_s10 = sphi %s2068_s10, %s2662_s10   ;;  %s1984_s30 = sphi %s2066_s30, %s2661_s30  }
   0x7   : > { %s2091_s15 = sadd.s32 1, %s1996_s12   ;;  %s228_s16 = sadd.s32 1, %s1992_s11 }
   0x8   : > { %s225_s17 = ssub.s32 %s1996_s12, %s2091_s15  ;;  %p238_p0 = scmp.ne.s32.totalorder %s1992_s11, %s1988_s10 }
   0x9   : > { %p226_p1 = scmp.eq.s32.totalorder %s225_s17, 0  ;;  %p239_p2 = scmp.eq.s32.totalorder %s2087_s13, 1 }
   0xa   : > { %p244_p3 = scmp.ne.s32.totalorder %s1988_s10, %s1984_s30  ;;  %p245_p4 = scmp.eq.s32.totalorder %s1716_s14, 1 }
   0xb   : > { %s2102_s18 = scalar_select %p226_p1, %s1992_s11, %s228_s16  }
   0xc   : > { %p2104_p5 = por %p239_p2, %p238_p0  ;;  %p2108_p6 = por %p245_p4, %p244_p3 }
   0xd   : > { %p1719_p7 = scmp.ge.s32.totalorder %s1996_s12, 1  ;;  %p299_p8 = scmp.lt.s32.totalorder %s1996_s12, 3 }
   0xf   : > { %p300_p9 = pnand %p1719_p7, %p299_p8 }
  0x10   : > { %s2655_s2 = sld [smem:[#allocation6_spill]] (!%p300_p9)  ;;  %p339_p10 = scmp.lt.s32.totalorder (!%p300_p9), %s2087_s13, 1 }
  0x11   : > { %303 = sbr.rel (%p300_p9) target bundleno = 2319 (0x90f), region = 56  ;;  %s2656_s1 = sld [smem:[#allocation5_spill]] (!%p300_p9) }
  0x12   : > { %s2643_s29 = smov (!%p300_p9), 6   ;;  %s2647_s21 = smov (!%p300_p9), 2  }
  0x13   : > { %s2003_s27 = smov (!%p300_p9), 4   ;;  %s2649_s14 = smov (!%p300_p9), 124  }
  0x14   : > { %s2005_s17 = smov (!%p300_p9), 12   ;;  %s2006_s23 = smov (!%p300_p9), 8  }
  0x15   : > { %s2007_s26 = smov (!%p300_p9), 120   ;;  %s2657_s28 = smov (!%p300_p9), 124  }
  0x16   : > { %v385_v0 = vld [vmem:[%s2655_s2 + $0xf8] sm:$0xff]  ;;  %v384_v2 = vld [vmem:[%s2655_s2 + $0xf0] sm:$0xff]  ;;  %v1998_v4 = vmov 0.0   ;;  %v383_v5 = vld [vmem:[%s2655_s2 + $0xe8] sm:$0xff]  ;;  %s2132_s16 = scalar_select %p339_p10, %s2087_s13, 1  ;;  %vm1999_vm0 = vmmov 0  }
  0x17   : > { %v369_v1 = vld [vmem:[%s2655_s2 + $0x78] sm:$0xff]  ;;  %1782 = vmatprep.subr.mxu0 %v385_v0  ;;  %v368_v3 = vld [vmem:[%s2655_s2 + $0x70] sm:$0xff]  ;;  %1847 = vmatprep.subr.mxu1 %v1998_v4  ;;  %v367_v6 = vld [vmem:[%s2655_s2 + $0x68] sm:$0xff]  ;;  %vm390_vm1 = vcmask 261120   ;;  %vm557_vm2 = vcmask 15360   ;;  %vm559_vm3 = vcmask 146432  }
  0x18   : > { %1783 = vmatpush3.msra.mxu0 %v369_v1  ;;  %1851 = vmatprep.mubr.msk.f32.mxu1 %vm1999_vm0, %v1998_v4  ;;  %v382_v7 = vld [vmem:[%s2655_s2 + $0xe0] sm:$0xff]  ;;  %s1879_s24 = smul.u32 24, %s2132_s16  ;;  %v381_v9 = vld [vmem:[%s2655_s2 + $0xd8] sm:$0xff]  ;;  %v380_v11 = vld [vmem:[%s2655_s2 + $0xd0] sm:$0xff]  ;;  %vm568_vm4 = vcmask 1040384   ;;  %vm617_vm5 = vcmask 1046528  }
  0x19   : > { %1784 = vmatprep.subr.mxu0 %v384_v2  ;;  %v366_v8 = vld [vmem:[%s2655_s2 + $0x60] sm:$0xff]  ;;  %v365_v10 = vld [vmem:[%s2655_s2 + $0x58] sm:$0xff]  ;;  %v364_v12 = vld [vmem:[%s2655_s2 + $0x50] sm:$0xff]  ;;  %vm672_vm6 = vcmask 1045504   ;;  %vm733_vm7 = vcmask 130048   ;;  %vm835_vm8 = vcmask 31744  }
  0x1a   : > { %1785 = vmatpush3.msra.mxu0 %v368_v3  ;;  %s2155_s22 = scalar_lea.vmem %s2656_s1, %s1879_s24  ;;  %v379_v13 = vld [vmem:[%s2655_s2 + $0xc8] sm:$0xff]  ;;  %v378_v17 = vld [vmem:[%s2655_s2 + $0xc0] sm:$0xff]  ;;  %v377_v19 = vld [vmem:[%s2655_s2 + $0xb8] sm:$0xff]  ;;  %s2645_s24 = smov 126   ;;  %vm837_vm9 = vcmask 162816   ;;  %vm839_vm10 = vcmask 179200  }
  0x1b   : > { %1786 = vmatprep.subr.mxu0 %v383_v5  ;;  %v349_v14 = vld [vmem:[%s2155_s22 + $0x8] sm:$0xff]  ;;  %v362_v18 = vld [vmem:[%s2655_s2 + $0x40] sm:$0xff]  ;;  %v361_v20 = vld [vmem:[%s2655_s2 + $0x38] sm:$0xff]  ;;  %vm849_vm11 = vcmask 1041408   ;;  %vm852_vm12 = vcmask 1042432   ;;  %vm954_vm13 = vcmask 1043456  }
  0x1c   : > { %1787 = vmatpush3.msra.mxu0 %v367_v6  ;;  %v363_v15 = vld [vmem:[%s2655_s2 + $0x48] sm:$0xff]  ;;  %v352_v16 = vmax.f32 %v349_v14, 0.0  ;;  %v376_v21 = vld [vmem:[%s2655_s2 + $0xb0] sm:$0xff]  ;;  %v374_v25 = vld [vmem:[%s2655_s2 + $0xa0] sm:$0xff]  ;;  %s2008_s1 = smov 28   ;;  %vm1426_vm14 = vcmask 392192  }
  0x1d   : > { %1788 = vmatprep.subr.mxu0 %v382_v7  ;;  %v360_v22 = vld [vmem:[%s2655_s2 + $0x30] sm:$0xff]  ;;  %v375_v23 = vld [vmem:[%s2655_s2 + $0xa8] sm:$0xff]  ;;  %v358_v26 = vld [vmem:[%s2655_s2 + $0x20] sm:$0xff]  ;;  %vm1428_vm15 = vcmask 523264  }
  0x1e   : > { %1789 = vmatpush3.msra.mxu0 %v366_v8  ;;  %458 = vmatprep.mubr.f32.mxu0 %v352_v16  ;;  %v359_v24 = vld [vmem:[%s2655_s2 + $0x28] sm:$0xff]  ;;  %v373_v27 = vld [vmem:[%s2655_s2 + $0x98] sm:$0xff]  ;;  %v372_v29 = vld [vmem:[%s2655_s2 + $0x90] sm:$0xff] }
  0x1f   : > { %1790 = vmatprep.subr.mxu0 %v381_v9  ;;  %v357_v28 = vld [vmem:[%s2655_s2 + $0x18] sm:$0xff]  ;;  %v356_v30 = vld [vmem:[%s2655_s2 + $0x10] sm:$0xff]  ;;  %v371_v31 = vld [vmem:[%s2655_s2 + $0x88] sm:$0xff] }
  0x20   : > { %1791 = vmatpush3.msra.mxu0 %v365_v10  ;;  %v348_v32 = vld [vmem:[%s2155_s22] sm:$0xff]  ;;  %v355_v33 = vld [vmem:[%s2655_s2 + $0x8] sm:$0xff]  ;;  %v389_v37 = vld [vmem:[%s2655_s2 + $0x118] sm:$0xff] }
  0x21   : > { %1792 = vmatprep.subr.mxu0 %v380_v11  ;;  %v370_v34 = vld [vmem:[%s2655_s2 + $0x80] sm:$0xff]  ;;  %v351_v36 = vmax.f32 %v348_v32, 0.0  ;;  %v388_v38 = vld [vmem:[%s2655_s2 + $0x110] sm:$0xff]  ;;  %v387_v40 = vld [vmem:[%s2655_s2 + $0x108] sm:$0xff] }
  0x22   : > { %1793 = vmatpush3.msra.mxu0 %v364_v12  ;;  %v354_v35 = vld [vmem:[%s2655_s2] sm:$0xff]  ;;  %v350_v39 = vld [vmem:[%s2155_s22 + $0x10] sm:$0xff]  ;;  %v1727_v54 = vld [vmem:[%s2639_s6 + $0xf] ss:$0 sm:$0xff]  ;;  %s2010_s22 = smov 62  }
  0x23   : > { %1794 = vmatprep.subr.mxu0 %v379_v13  ;;  %v353_v41 = vmax.f32 %v350_v39, 0.0  ;;  %v386_v42 = vld [vmem:[%s2655_s2 + $0x100] sm:$0xff]  ;;  %v1730_v55 = vld [vmem:[%s2639_s6 + $0x12] ss:$0 sm:$0xff]  ;;  %v1728_v56 = vld [vmem:[%s2639_s6 + $0x10] ss:$0 sm:$0xff] }
  0x24   : > { %1795 = vmatpush3.msra.mxu0 %v363_v15  ;;  %v1724_v47 = vld [vmem:[%s2639_s6] ss:$0 sm:$0xff]  ;;  %v1725_v49 = vld [vmem:[%s2639_s6 + $0x7] ss:$0 sm:$0xff]  ;;  %v1733_v57 = vld [vmem:[%s2639_s6 + $0x15] ss:$0 sm:$0xff] }
  0x25   : > { %1796 = vmatprep.subr.mxu0 %v378_v17  ;;  %v1731_v58 = vld [vmem:[%s2639_s6 + $0x13] ss:$0 sm:$0xff]  ;;  %v1734_v59 = vld [vmem:[%s2639_s6 + $0x16] ss:$0 sm:$0xff]  ;;  %v1729_v8 = vld [vmem:[%s2639_s6 + $0x11] ss:$0 sm:$0xff] }
  0x26   : > { %1797 = vmatpush3.msra.mxu0 %v362_v18  ;;  %v1732_v9 = vld [vmem:[%s2639_s6 + $0x14] ss:$0 sm:$0xff]  ;;  %s2009_s2 = smov 14  }
  0x27   : > { %1798 = vmatprep.subr.mxu0 %v377_v19 }
  0x28   : > { %1799 = vmatpush3.msra.mxu0 %v361_v20 }
  0x29   : > { %1800 = vmatprep.subr.mxu0 %v376_v21 }
  0x2a   : > { %1801 = vmatpush3.msra.mxu0 %v360_v22 }
  0x2b   : > { %1802 = vmatprep.subr.mxu0 %v375_v23 }
  0x2c   : > { %1803 = vmatpush3.msra.mxu0 %v359_v24 }
  0x2d   : > { %1804 = vmatprep.subr.mxu0 %v374_v25 }
  0x2e   : > { %1805 = vmatpush3.msra.mxu0 %v358_v26 }
  0x2f   : > { %1806 = vmatprep.subr.mxu0 %v373_v27 }
  0x30   : > { %1807 = vmatpush3.msra.mxu0 %v357_v28 }
  0x31   : > { %1808 = vmatprep.subr.mxu0 %v372_v29 }
  0x32   : > { %1809 = vmatpush3.msra.mxu0 %v356_v30 }
  0x33   : > { %1810 = vmatprep.subr.mxu0 %v371_v31 }
  0x34   : > { %1811 = vmatpush3.msra.mxu0 %v355_v33 }
  0x35   : > { %1812 = vmatprep.subr.mxu0 %v370_v34 }
  0x36   : > { %1813 = vmatpush3.msra.mxu0 %v354_v35 }
  0x37   : > { %459 = vmatmul.mubr.f32.vlgmr.msra.gmra.mxu0 %v351_v36  ;;  %1836 = vmatprep.subr.mxu0 %v1998_v4 }
  0x38   : > { %1837 = vmatpush3.msra.mxu0 %v389_v37  ;;  %1844 = vmatprep.mubr.msk.f32.mxu0 %vm1999_vm0, %v1998_v4 }
  0x39   : > { %1838 = vmatprep.subr.mxu0 %v1998_v4 }
  0x3a   : > { %1839 = vmatpush3.msra.mxu0 %v388_v38 }
  0x3b   : > { %1840 = vmatprep.subr.mxu0 %v1998_v4 }
  0x3c   : > { %1841 = vmatpush3.msra.mxu0 %v387_v40 }
  0x3d   : > { %1842 = vmatprep.subr.mxu0 %v1998_v4 }
  0x3e   : > { %1843 = vmatpush3.msra.mxu0 %v386_v42 }
  0x3f   : > { %1845 = vmatmul.mubr.msk.f32.vlgmr.msra.gmra.mxu0 %vm390_vm1, %v353_v41  ;;  %1868 = vmatprep.subr.mxu0 %v1998_v4 }
  0x40   : > { %1876 = vmatprep.mubr.msk.f32.mxu0 %vm1999_vm0, %v1998_v4 }
  0xf7   : > { %v1814_v43 = vpop.f32.mrf.mxu0 }
  0xf9   : > { %v1815_v44 = vpop.f32.mrf.mxu0 }
  0xfa   : > { %v1816_v45 = vadd.f32 %v1815_v44, %v1814_v43 }
  0xff   : > { %v530_v46 = vpop.f32.mrf.mxu0 }
 0x100   : > { %v531_v48 = vadd.f32 %v1816_v45, %v530_v46  ;;  %v732_v46 = vld [vmem:[%s2636_s3 + $0x8] sm:$0xff] }
 0x101   : > { %v1846_v50 = vpop.f32.mrf.mxu0  ;;  %1848 = vmatpush3.msra.mxu1 %v732_v46 }
 0x102   : > { %v539_v51 = vmul.f32 %v1724_v47, %v531_v48  ;;  %v731_v47 = vld [vmem:[%s2636_s3] sm:$0xff]  ;;  %1849 = vmatprep.subr.mxu1 %v1998_v4 }
 0x103   : > { %1850 = vmatpush3.msra.mxu1 %v731_v47 }
 0x104   : > { %v2254_v52 = vadd.f32 %v1725_v49, %v539_v51  ;;  %1854 = vmatprep.subr.mxu1 %v1998_v4  ;;  %v1726_v49 = vld [vmem:[%s2639_s6 + $0xe] ss:$0 sm:$0xff] }
 0x106   : > { %v546_v53 = vmax.f32 %v2254_v52, 0.0 }
 0x108   : > { %554 = vrot.lane.b32.xlu1 %v546_v53, %s2643_s29  ;;  %548 = vrot.lane.b32.xlu0 %v546_v53, %s2645_s24 }
 0x10c   : > { %584 = vrot.lane.b32.xlu1 %v1727_v54, %s2647_s21  ;;  %551 = vrot.lane.b32.xlu0 %v546_v53, %s2647_s21 }
 0x110   : > { %629 = vrot.lane.b32.xlu1 %v1730_v55, %s2647_s21  ;;  %599 = vrot.lane.b32.xlu0 %v1728_v56, %s2003_s27 }
 0x114   : > { %684 = vrot.lane.b32.xlu1 %v1733_v57, %s2647_s21  ;;  %649 = vrot.lane.b32.xlu0 %v1731_v58, %s2003_s27  ;;  %s2658_s21 = smov 2  }
 0x118   : > { %704 = vrot.lane.b32.xlu0 %v1734_v59, %s2003_s27 }
 0x17a   : > { %v555_v60 = vpop.permute.xlu1 %554  ;;  %v549_v61 = vpop.permute.xlu0 %548 }
 0x17e   : > { %v585_v62 = vpop.permute.xlu1 %584  ;;  %v552_v63 = vpop.permute.xlu0 %551 }
 0x17f   : > { %v558_v0 = vsel %vm557_vm2, %v549_v61, %v552_v63 }
 0x180   : > { %v560_v1 = vsel %vm559_vm3, %v558_v0, %v555_v60  ;;  %v1735_v0 = vld [vmem:[%s2639_s6 + $0x1] ss:$0 sm:$0xff] }
 0x181   : > { %v562_v2 = vrot.slane %v560_v1, 1  ;;  %v564_v3 = vrot.slane %v560_v1, 7  ;;  %v566_v5 = vrot.slane %v560_v1, 5 }
 0x182   : > { %v630_v6 = vpop.permute.xlu1 %629  ;;  %v600_v7 = vpop.permute.xlu0 %599 }
 0x183   : > { %v569_v10 = vsel %vm568_vm4, %v562_v2, %v564_v3  ;;  %v570_v11 = vsel %vm568_vm4, %v564_v3, %v566_v5  ;;  %v1736_v3 = vld [vmem:[%s2639_s6 + $0x8] ss:$0 sm:$0xff] }
 0x184   : > { %v632_v12 = vmul.f32 %v630_v6, %v569_v10  ;;  %v633_v13 = vmul.f32 %v630_v6, %v570_v11  ;;  %v602_v14 = vmul.f32 %v600_v7, %v569_v10  ;;  %v587_v15 = vmul.f32 %v585_v62, %v569_v10 }
 0x185   : > { %v613_v16 = vmul.f32 %v1729_v8, %v569_v10  ;;  %v614_v17 = vmul.f32 %v1729_v8, %v570_v11  ;;  %v668_v18 = vmul.f32 %v1732_v9, %v569_v10  ;;  %v669_v23 = vmul.f32 %v1732_v9, %v570_v11  ;;  %v1738_v8 = vld [vmem:[%s2639_s6 + $0x2] ss:$0 sm:$0xff] }
 0x186   : > { %v636_v19 = vrot.slane %v632_v12, 1  ;;  %v637_v20 = vrot.slane %v633_v13, 1  ;;  %v685_v21 = vpop.permute.xlu1 %684  ;;  %589 = vrot.lane.b32.xlu1 %v587_v15, %s2645_s24  ;;  %604 = vrot.lane.b32.xlu0 %v602_v14, %s2649_s14  ;;  %v650_v22 = vpop.permute.xlu0 %649  ;;  %v576_v50 = vmul.f32 %v1726_v49, %v569_v10 }
 0x187   : > { %v687_v24 = vmul.f32 %v685_v21, %v569_v10  ;;  %v688_v25 = vmul.f32 %v685_v21, %v570_v11  ;;  %v652_v26 = vmul.f32 %v650_v22, %v569_v10  ;;  %v653_v27 = vmul.f32 %v650_v22, %v570_v11 }
 0x188   : > { %v638_v28 = vsel %vm617_vm5, %v636_v19, %v637_v20  ;;  %v618_v29 = vrot.slane %v613_v16, 1  ;;  %v619_v30 = vrot.slane %v614_v17, 1  ;;  %v673_v31 = vrot.slane %v668_v18, 2  ;;  %v1742_v16 = vld [vmem:[%s2639_s6 + $0x19] ss:$0 sm:$0xff] }
 0x189   : > { %v691_v32 = vrot.slane %v687_v24, 2  ;;  %v692_v33 = vrot.slane %v688_v25, 2  ;;  %v656_v34 = vrot.slane %v652_v26, 1  ;;  %v657_v35 = vrot.slane %v653_v27, 1  ;;  %v1741_v17 = vld [vmem:[%s2639_s6 + $0x18] ss:$0 sm:$0xff] }
 0x18a   : > { %639 = vrot.lane.b32.xlu1 %v638_v28, %s2645_s24  ;;  %v705_v36 = vpop.permute.xlu0 %704  ;;  %v620_v37 = vsel %vm617_vm5, %v618_v29, %v619_v30  ;;  %v674_v38 = vrot.slane %v669_v23, 2  ;;  %v1744_v18 = vld [vmem:[%s2639_s6 + $0x1b] ss:$0 sm:$0xff]  ;;  %v1748_v19 = vld [vmem:[%s2639_s6 + $0x1f] ss:$0 sm:$0xff] }
 0x18b   : > { %v707_v39 = vmul.f32 %v705_v36, %v569_v10  ;;  %v708_v40 = vmul.f32 %v705_v36, %v570_v11  ;;  %v658_v41 = vsel %vm617_vm5, %v656_v34, %v657_v35  ;;  %v693_v45 = vsel %vm672_vm6, %v691_v32, %v692_v33  ;;  %v1739_v10 = vld [vmem:[%s2639_s6 + $0x9] ss:$0 sm:$0xff]  ;;  %v1747_v20 = vld [vmem:[%s2639_s6 + $0x1e] ss:$0 sm:$0xff]  ;;  %v1743_v34 = vld [vmem:[%s2639_s6 + $0x1a] ss:$0 sm:$0xff] }
 0x18c   : > { %659 = vrot.lane.b32.xlu0 %v658_v41, %s2649_s14  ;;  %v675_v42 = vsel %vm672_vm6, %v673_v31, %v674_v38 }
 0x18d   : > { %v711_v43 = vrot.slane %v707_v39, 2  ;;  %v712_v44 = vrot.slane %v708_v40, 2 }
 0x18e   : > { %694 = vrot.lane.b32.xlu1 %v693_v45, %s2645_s24  ;;  %s2011_s24 = smov 48  }
 0x18f   : > { %v713_v48 = vsel %vm672_vm6, %v711_v43, %v712_v44 }
 0x190   : > { %714 = vrot.lane.b32.xlu0 %v713_v48, %s2649_s14 }
 0x1f8   : > { %v590_v51 = vpop.permute.xlu1 %589  ;;  %v605_v54 = vpop.permute.xlu0 %604 }
 0x1f9   : > { %v592_v53 = vadd.f32 %v590_v51, %v576_v50 }
 0x1fb   : > { %v607_v55 = vadd.f32 %v605_v54, %v592_v53 }
 0x1fc   : > { %v640_v57 = vpop.permute.xlu1 %639 }
 0x1fd   : > { %v622_v56 = vadd.f32 %v620_v37, %v607_v55  ;;  %v1746_v37 = vld [vmem:[%s2639_s6 + $0x1d] ss:$0 sm:$0xff] }
 0x1fe   : > { %v660_v59 = vpop.permute.xlu0 %659 }
 0x1ff   : > { %v642_v58 = vadd.f32 %v640_v57, %v622_v56 }
 0x200   : > { %v695_v62 = vpop.permute.xlu1 %694 }
 0x201   : > { %v662_v60 = vadd.f32 %v660_v59, %v642_v58 }
 0x202   : > { %v715_v1 = vpop.permute.xlu0 %714 }
 0x203   : > { %v677_v61 = vadd.f32 %v675_v42, %v662_v60 }
 0x205   : > { %v697_v63 = vadd.f32 %v695_v62, %v677_v61 }
 0x207   : > { %v717_v2 = vadd.f32 %v715_v1, %v697_v63 }
 0x209   : > { %v723_v5 = vmul.f32 %v1735_v0, %v717_v2 }
 0x20b   : > { %v729_v6 = vadd.f32 %v1736_v3, %v723_v5 }
 0x20d   : > { %v730_v7 = vmax.f32 %v729_v6, 0.0 }
 0x20f   : > { %1852 = vmatmul.mubr.msk.f32.vlgmr.msra.gmra.mxu1 %vm733_vm7, %v730_v7 }
 0x210   : > { %1858 = vmatprep.mubr.msk.f32.mxu1 %vm1999_vm0, %v1998_v4 }
 0x2cf   : > { %v803_v9 = vpop.f32.mrf.mxu1 }
 0x2d0   : > { %v812_v11 = vmul.f32 %v1738_v8, %v803_v9 }
 0x2d1   : > { %v1853_v12 = vpop.f32.mrf.mxu1 }
 0x2d2   : > { %v818_v13 = vadd.f32 %v1739_v10, %v812_v11 }
 0x2d4   : > { %v2333_v14 = vadd.f32 %v818_v13, %v2254_v52  ;;  %v1745_v52 = vld [vmem:[%s2639_s6 + $0x1c] ss:$0 sm:$0xff] }
 0x2d6   : > { %v820_v15 = vmax.f32 %v2333_v14, 0.0 }
 0x2d8   : > { %825 = vrot.lane.b32.xlu0 %v820_v15, %s2003_s27  ;;  %822 = vrot.lane.b32.xlu1 %v820_v15, %s2649_s14  ;;  %s2659_s14 = smov 126  }
 0x2dc   : > { %831 = vrot.lane.b32.xlu0 %v820_v15, %s2005_s17  ;;  %828 = vrot.lane.b32.xlu1 %v820_v15, %s2006_s23  ;;  %s2660_s17 = smov 6  }
 0x2e0   : > { %882 = vrot.lane.b32.xlu0 %v1742_v16, %s2006_s23  ;;  %867 = vrot.lane.b32.xlu1 %v1741_v17, %s2003_s27  ;;  %v1751_v16 = vld [vmem:[%s2636_s3 + $0x10] sm:$0xff] }
 0x2e1   : > { %v1740_v17 = vld [vmem:[%s2639_s6 + $0x17] ss:$0 sm:$0xff] }
 0x2e4   : > { %931 = vrot.lane.b32.xlu0 %v1745_v52, %s2006_s23  ;;  %911 = vrot.lane.b32.xlu1 %v1744_v18, %s2003_s27 }
 0x2e8   : > { %986 = vrot.lane.b32.xlu0 %v1748_v19, %s2006_s23  ;;  %966 = vrot.lane.b32.xlu1 %v1747_v20, %s2003_s27  ;;  %s2013_s23 = smov 76  }
 0x34a   : > { %v826_v21 = vpop.permute.xlu0 %825  ;;  %v823_v22 = vpop.permute.xlu1 %822 }
 0x34b   : > { %v834_v23 = vsel %vm557_vm2, %v823_v22, %v820_v15  ;;  %v1752_v15 = vld [vmem:[%s2636_s3 + $0x18] sm:$0xff] }
 0x34c   : > { %v836_v25 = vsel %vm835_vm8, %v834_v23, %v826_v21  ;;  %1855 = vmatpush3.msra.mxu1 %v1752_v15 }
 0x34d   : > { %1856 = vmatprep.subr.mxu1 %v1998_v4 }
 0x34e   : > { %v832_v24 = vpop.permute.xlu0 %831  ;;  %v829_v26 = vpop.permute.xlu1 %828  ;;  %1857 = vmatpush3.msra.mxu1 %v1751_v16 }
 0x34f   : > { %v838_v27 = vsel %vm837_vm9, %v836_v25, %v829_v26  ;;  %1861 = vmatprep.subr.mxu1 %v1998_v4 }
 0x350   : > { %v840_v28 = vsel %vm839_vm10, %v838_v27, %v832_v24 }
 0x351   : > { %v842_v29 = vrot.slane %v840_v28, 2  ;;  %v844_v30 = vrot.slane %v840_v28, 6  ;;  %v846_v31 = vrot.slane %v840_v28, 4 }
 0x352   : > { %v883_v32 = vpop.permute.xlu0 %882  ;;  %v868_v33 = vpop.permute.xlu1 %867 }
 0x353   : > { %v848_v35 = vsel %vm568_vm4, %v842_v29, %v840_v28  ;;  %v851_v36 = vsel %vm849_vm11, %v844_v30, %v846_v31  ;;  %v1749_v31 = vld [vmem:[%s2639_s6 + $0x3] ss:$0 sm:$0xff] }
 0x354   : > { %v850_v38 = vsel %vm849_vm11, %v848_v35, %v844_v30  ;;  %v853_v39 = vsel %vm852_vm12, %v851_v36, %v842_v29 }
 0x355   : > { %v885_v40 = vmul.f32 %v883_v32, %v850_v38  ;;  %v870_v41 = vmul.f32 %v868_v33, %v850_v38  ;;  %v896_v42 = vmul.f32 %v1743_v34, %v850_v38  ;;  %v897_v45 = vmul.f32 %v1743_v34, %v853_v39  ;;  %v1750_v33 = vld [vmem:[%s2639_s6 + $0xa] ss:$0 sm:$0xff] }
 0x356   : > { %v932_v43 = vpop.permute.xlu0 %931  ;;  %v912_v44 = vpop.permute.xlu1 %911  ;;  %v950_v46 = vmul.f32 %v1746_v37, %v850_v38  ;;  %v951_v47 = vmul.f32 %v1746_v37, %v853_v39  ;;  %v859_v52 = vmul.f32 %v1740_v17, %v850_v38  ;;  %v1754_v37 = vld [vmem:[%s2639_s6 + $0x4] ss:$0 sm:$0xff] }
 0x357   : > { %v934_v48 = vmul.f32 %v932_v43, %v850_v38  ;;  %v935_v49 = vmul.f32 %v932_v43, %v853_v39  ;;  %v914_v50 = vmul.f32 %v912_v44, %v850_v38  ;;  %v915_v51 = vmul.f32 %v912_v44, %v853_v39  ;;  %887 = vrot.lane.b32.xlu0 %v885_v40, %s2007_s26 }
 0x358   : > { %872 = vrot.lane.b32.xlu1 %v870_v41, %s2657_s28  ;;  %v900_v53 = vrot.slane %v896_v42, 2  ;;  %v901_v54 = vrot.slane %v897_v45, 2  ;;  %v955_v55 = vrot.slane %v950_v46, 4  ;;  %v956_v56 = vrot.slane %v951_v47, 4  ;;  %v1757_v45 = vld [vmem:[%s2639_s6 + $0x21] ss:$0 sm:$0xff] }
 0x359   : > { %v938_v57 = vrot.slane %v934_v48, 2  ;;  %v939_v58 = vrot.slane %v935_v49, 2  ;;  %v918_v59 = vrot.slane %v914_v50, 2  ;;  %v919_v60 = vrot.slane %v915_v51, 2  ;;  %v1760_v46 = vld [vmem:[%s2639_s6 + $0x24] ss:$0 sm:$0xff] }
 0x35a   : > { %v987_v61 = vpop.permute.xlu0 %986  ;;  %v967_v62 = vpop.permute.xlu1 %966  ;;  %v902_v63 = vsel %vm672_vm6, %v900_v53, %v901_v54  ;;  %v957_v0 = vsel %vm954_vm13, %v955_v55, %v956_v56  ;;  %v1763_v47 = vld [vmem:[%s2639_s6 + $0x27] ss:$0 sm:$0xff]  ;;  %v1761_v48 = vld [vmem:[%s2639_s6 + $0x25] ss:$0 sm:$0xff]  ;;  %v1764_v49 = vld [vmem:[%s2639_s6 + $0x28] ss:$0 sm:$0xff] }
 0x35b   : > { %v989_v1 = vmul.f32 %v987_v61, %v850_v38  ;;  %v990_v2 = vmul.f32 %v987_v61, %v853_v39  ;;  %v969_v3 = vmul.f32 %v967_v62, %v850_v38  ;;  %v970_v5 = vmul.f32 %v967_v62, %v853_v39  ;;  %v1755_v39 = vld [vmem:[%s2639_s6 + $0xb] ss:$0 sm:$0xff]  ;;  %v1762_v61 = vld [vmem:[%s2639_s6 + $0x26] ss:$0 sm:$0xff] }
 0x35c   : > { %v940_v6 = vsel %vm672_vm6, %v938_v57, %v939_v58  ;;  %v920_v7 = vsel %vm672_vm6, %v918_v59, %v919_v60  ;;  %v1759_v60 = vld [vmem:[%s2639_s6 + $0x23] ss:$0 sm:$0xff] }
 0x35d   : > { %v993_v8 = vrot.slane %v989_v1, 4  ;;  %v994_v9 = vrot.slane %v990_v2, 4  ;;  %v973_v10 = vrot.slane %v969_v3, 4  ;;  %v974_v11 = vrot.slane %v970_v5, 4  ;;  %941 = vrot.lane.b32.xlu0 %v940_v6, %s2007_s26  ;;  %921 = vrot.lane.b32.xlu1 %v920_v7, %s2657_s28 }
 0x35f   : > { %v995_v12 = vsel %vm954_vm13, %v993_v8, %v994_v9  ;;  %v975_v13 = vsel %vm954_vm13, %v973_v10, %v974_v11 }
 0x361   : > { %996 = vrot.lane.b32.xlu0 %v995_v12, %s2007_s26  ;;  %976 = vrot.lane.b32.xlu1 %v975_v13, %s2657_s28 }
 0x3c9   : > { %v888_v20 = vpop.permute.xlu0 %887 }
 0x3ca   : > { %v873_v18 = vpop.permute.xlu1 %872 }
 0x3cb   : > { %v875_v19 = vadd.f32 %v873_v18, %v859_v52 }
 0x3cd   : > { %v890_v21 = vadd.f32 %v888_v20, %v875_v19 }
 0x3cf   : > { %v904_v22 = vadd.f32 %v902_v63, %v890_v21  ;;  %v922_v23 = vpop.permute.xlu1 %921  ;;  %v942_v25 = vpop.permute.xlu0 %941 }
 0x3d1   : > { %v924_v24 = vadd.f32 %v922_v23, %v904_v22 }
 0x3d3   : > { %v944_v26 = vadd.f32 %v942_v25, %v924_v24  ;;  %v977_v28 = vpop.permute.xlu1 %976  ;;  %v997_v30 = vpop.permute.xlu0 %996 }
 0x3d5   : > { %v959_v27 = vadd.f32 %v957_v0, %v944_v26 }
 0x3d7   : > { %v979_v29 = vadd.f32 %v977_v28, %v959_v27 }
 0x3d9   : > { %v999_v32 = vadd.f32 %v997_v30, %v979_v29 }
 0x3db   : > { %v1005_v34 = vmul.f32 %v1749_v31, %v999_v32 }
 0x3dd   : > { %v1011_v35 = vadd.f32 %v1750_v33, %v1005_v34 }
 0x3df   : > { %v1012_v36 = vmax.f32 %v1011_v35, 0.0  ;;  %v1768_v35 = vld [vmem:[%s2636_s3 + $0x28] sm:$0xff] }
 0x3e1   : > { %1859 = vmatmul.mubr.msk.f32.vlgmr.msra.gmra.mxu1 %vm733_vm7, %v1012_v36  ;;  %v1767_v36 = vld [vmem:[%s2636_s3 + $0x20] sm:$0xff] }
 0x3e2   : > { %1865 = vmatprep.mubr.msk.f32.mxu1 %vm1999_vm0, %v1998_v4  ;;  %1862 = vmatpush3.msra.mxu1 %v1768_v35  ;;  %vm1430_vm0 = vcmask 654336  }
 0x3e3   : > { %1863 = vmatprep.subr.mxu1 %v1998_v4 }
 0x3e4   : > { %1864 = vmatpush3.msra.mxu1 %v1767_v36 }
 0x3e5   : > { %1456 = vmatprep.subr.mxu1 %v1998_v4 }
 0x4a1   : > { %v1085_v38 = vpop.f32.mrf.mxu1 }
 0x4a2   : > { %v1094_v40 = vmul.f32 %v1754_v37, %v1085_v38 }
 0x4a3   : > { %v1860_v41 = vpop.f32.mrf.mxu1 }
 0x4a4   : > { %v1100_v42 = vadd.f32 %v1755_v39, %v1094_v40  ;;  %v1756_v40 = vld [vmem:[%s2639_s6 + $0x20] ss:$0 sm:$0xff] }
 0x4a6   : > { %v2406_v43 = vadd.f32 %v1100_v42, %v2333_v14  ;;  %v1758_v14 = vld [vmem:[%s2639_s6 + $0x22] ss:$0 sm:$0xff] }
 0x4a8   : > { %v1102_v44 = vmax.f32 %v2406_v43, 0.0 }
 0x4aa   : > { %1107 = vrot.lane.b32.xlu0 %v1102_v44, %s2658_s21  ;;  %1104 = vrot.lane.b32.xlu1 %v1102_v44, %s2659_s14 }
 0x4ae   : > { %1137 = vrot.lane.b32.xlu0 %v1757_v45, %s2658_s21  ;;  %1110 = vrot.lane.b32.xlu1 %v1102_v44, %s2660_s17 }
 0x4b2   : > { %1181 = vrot.lane.b32.xlu0 %v1760_v46, %s2658_s21  ;;  %1152 = vrot.lane.b32.xlu1 %v1758_v14, %s2003_s27 }
 0x4b6   : > { %1235 = vrot.lane.b32.xlu0 %v1763_v47, %s2658_s21  ;;  %1201 = vrot.lane.b32.xlu1 %v1761_v48, %s2003_s27 }
 0x4ba   : > { %1255 = vrot.lane.b32.xlu1 %v1764_v49, %s2003_s27  ;;  %s2012_s27 = smov 96  }
 0x51c   : > { %v1108_v50 = vpop.permute.xlu0 %1107  ;;  %v1105_v51 = vpop.permute.xlu1 %1104 }
 0x51d   : > { %v1113_v53 = vsel %vm557_vm2, %v1105_v51, %v1108_v50 }
 0x520   : > { %v1138_v54 = vpop.permute.xlu0 %1137  ;;  %v1111_v55 = vpop.permute.xlu1 %1110 }
 0x521   : > { %v1114_v56 = vsel %vm559_vm3, %v1113_v53, %v1111_v55  ;;  %v1765_v55 = vld [vmem:[%s2639_s6 + $0x5] ss:$0 sm:$0xff] }
 0x522   : > { %v1116_v57 = vrot.slane %v1114_v56, 1  ;;  %v1118_v58 = vrot.slane %v1114_v56, 7  ;;  %v1120_v59 = vrot.slane %v1114_v56, 5 }
 0x524   : > { %v1122_v62 = vsel %vm568_vm4, %v1116_v57, %v1118_v58  ;;  %v1123_v63 = vsel %vm568_vm4, %v1118_v58, %v1120_v59  ;;  %v1182_v0 = vpop.permute.xlu0 %1181  ;;  %v1153_v1 = vpop.permute.xlu1 %1152  ;;  %v1766_v58 = vld [vmem:[%s2639_s6 + $0xc] ss:$0 sm:$0xff] }
 0x525   : > { %v1184_v2 = vmul.f32 %v1182_v0, %v1122_v62  ;;  %v1185_v3 = vmul.f32 %v1182_v0, %v1123_v63  ;;  %v1155_v5 = vmul.f32 %v1153_v1, %v1122_v62  ;;  %v1140_v6 = vmul.f32 %v1138_v54, %v1122_v62  ;;  %v1771_v0 = vld [vmem:[%s2639_s6 + $0xd] ss:$0 sm:$0xff] }
 0x526   : > { %v1166_v7 = vmul.f32 %v1759_v60, %v1122_v62  ;;  %v1167_v8 = vmul.f32 %v1759_v60, %v1123_v63  ;;  %v1220_v9 = vmul.f32 %v1762_v61, %v1122_v62  ;;  %v1221_v12 = vmul.f32 %v1762_v61, %v1123_v63 }
 0x527   : > { %v1188_v10 = vrot.slane %v1184_v2, 1  ;;  %v1189_v11 = vrot.slane %v1185_v3, 1  ;;  %1142 = vrot.lane.b32.xlu0 %v1140_v6, %s2659_s14  ;;  %1157 = vrot.lane.b32.xlu1 %v1155_v5, %s2657_s28  ;;  %v1129_v41 = vmul.f32 %v1756_v40, %v1122_v62 }
 0x528   : > { %v1236_v13 = vpop.permute.xlu0 %1235  ;;  %v1202_v15 = vpop.permute.xlu1 %1201  ;;  %v1170_v16 = vrot.slane %v1166_v7, 1  ;;  %v1171_v17 = vrot.slane %v1167_v8, 1  ;;  %v1224_v52 = vrot.slane %v1220_v9, 2  ;;  %v1225_v24 = vrot.slane %v1221_v12, 2  ;;  %v1451_v7 = vld [vmem:[%s2637_s4 + $0x78] sm:$0xff]  ;;  %v1450_v8 = vld [vmem:[%s2637_s4 + $0x70] sm:$0xff] }
 0x529   : > { %v1238_v18 = vmul.f32 %v1236_v13, %v1122_v62  ;;  %v1239_v19 = vmul.f32 %v1236_v13, %v1123_v63  ;;  %v1204_v20 = vmul.f32 %v1202_v15, %v1122_v62  ;;  %v1205_v21 = vmul.f32 %v1202_v15, %v1123_v63  ;;  %v1448_v9 = vld [vmem:[%s2637_s4 + $0x60] sm:$0xff]  ;;  %v1445_v12 = vld [vmem:[%s2637_s4 + $0x48] sm:$0xff]  ;;  %v1443_v15 = vld [vmem:[%s2637_s4 + $0x38] sm:$0xff] }
 0x52a   : > { %v1190_v22 = vsel %vm617_vm5, %v1188_v10, %v1189_v11  ;;  %v1172_v23 = vsel %vm617_vm5, %v1170_v16, %v1171_v17  ;;  %v1226_v30 = vsel %vm672_vm6, %v1224_v52, %v1225_v24  ;;  %v1447_v10 = vld [vmem:[%s2637_s4 + $0x58] sm:$0xff]  ;;  %v1446_v11 = vld [vmem:[%s2637_s4 + $0x50] sm:$0xff]  ;;  %v1444_v13 = vld [vmem:[%s2637_s4 + $0x40] sm:$0xff] }
 0x52b   : > { %v1242_v25 = vrot.slane %v1238_v18, 2  ;;  %v1243_v26 = vrot.slane %v1239_v19, 2  ;;  %v1208_v27 = vrot.slane %v1204_v20, 1  ;;  %v1209_v28 = vrot.slane %v1205_v21, 1  ;;  %1191 = vrot.lane.b32.xlu0 %v1190_v22, %s2659_s14  ;;  %v1442_v16 = vld [vmem:[%s2637_s4 + $0x30] sm:$0xff]  ;;  %v1441_v17 = vld [vmem:[%s2637_s4 + $0x28] sm:$0xff] }
 0x52c   : > { %v1256_v29 = vpop.permute.xlu1 %1255  ;;  %v1440_v52 = vld [vmem:[%s2637_s4 + $0x20] sm:$0xff]  ;;  %v1439_v18 = vld [vmem:[%s2637_s4 + $0x18] sm:$0xff]  ;;  %v1438_v20 = vld [vmem:[%s2637_s4 + $0x10] sm:$0xff] }
 0x52d   : > { %v1258_v31 = vmul.f32 %v1256_v29, %v1122_v62  ;;  %v1259_v32 = vmul.f32 %v1256_v29, %v1123_v63  ;;  %v1210_v33 = vsel %vm617_vm5, %v1208_v27, %v1209_v28  ;;  %v1244_v34 = vsel %vm672_vm6, %v1242_v25, %v1243_v26  ;;  %v1770_v62 = vld [vmem:[%s2639_s6 + $0x6] ss:$0 sm:$0xff]  ;;  %v1437_v21 = vld [vmem:[%s2637_s4 + $0x8] sm:$0xff] }
 0x52e   : > { %1211 = vrot.lane.b32.xlu1 %v1210_v33, %s2657_s28  ;;  %v1436_v25 = vld [vmem:[%s2637_s4] sm:$0xff]  ;;  %v1453_v26 = vld [vmem:[%s2637_s4 + $0x88] sm:$0xff] }
 0x52f   : > { %v1262_v37 = vrot.slane %v1258_v31, 2  ;;  %v1263_v38 = vrot.slane %v1259_v32, 2  ;;  %1245 = vrot.lane.b32.xlu0 %v1244_v34, %s2659_s14  ;;  %v1452_v33 = vld [vmem:[%s2637_s4 + $0x80] sm:$0xff] }
 0x531   : > { %v1264_v39 = vsel %vm672_vm6, %v1262_v37, %v1263_v38 }
 0x532   : > { %1265 = vrot.lane.b32.xlu1 %v1264_v39, %s2657_s28 }
 0x599   : > { %v1143_v42 = vpop.permute.xlu0 %1142  ;;  %v1158_v45 = vpop.permute.xlu1 %1157 }
 0x59a   : > { %v1145_v44 = vadd.f32 %v1143_v42, %v1129_v41 }
 0x59c   : > { %v1160_v46 = vadd.f32 %v1158_v45, %v1145_v44 }
 0x59d   : > { %v1192_v47 = vpop.permute.xlu0 %1191 }
 0x59e   : > { %v1174_v14 = vadd.f32 %v1172_v23, %v1160_v46 }
 0x5a0   : > { %v1194_v48 = vadd.f32 %v1192_v47, %v1174_v14  ;;  %v1212_v49 = vpop.permute.xlu1 %1211 }
 0x5a1   : > { %v1246_v53 = vpop.permute.xlu0 %1245 }
 0x5a2   : > { %v1214_v50 = vadd.f32 %v1212_v49, %v1194_v48 }
 0x5a4   : > { %v1228_v51 = vadd.f32 %v1226_v30, %v1214_v50  ;;  %v1266_v56 = vpop.permute.xlu1 %1265 }
 0x5a6   : > { %v1248_v54 = vadd.f32 %v1246_v53, %v1228_v51 }
 0x5a8   : > { %v1268_v57 = vadd.f32 %v1266_v56, %v1248_v54  ;;  %v1542_v56 = vld [vmem:[%s2638_s5 + $0x18] sm:$0xff] }
 0x5a9   : > { %1869 = vmatpush3.msra.mxu0 %v1542_v56 }
 0x5aa   : > { %v1274_v59 = vmul.f32 %v1765_v55, %v1268_v57  ;;  %1870 = vmatprep.subr.mxu0 %v1998_v4  ;;  %v1541_v57 = vld [vmem:[%s2638_s5 + $0x10] sm:$0xff] }
 0x5ab   : > { %1871 = vmatpush3.msra.mxu0 %v1541_v57 }
 0x5ac   : > { %v1280_v60 = vadd.f32 %v1766_v58, %v1274_v59  ;;  %v1540_v58 = vld [vmem:[%s2638_s5 + $0x8] sm:$0xff]  ;;  %1872 = vmatprep.subr.mxu0 %v1998_v4  ;;  %v1539_v59 = vld [vmem:[%s2638_s5] sm:$0xff] }
 0x5ad   : > { %1873 = vmatpush3.msra.mxu0 %v1540_v58 }
 0x5ae   : > { %v1281_v61 = vmax.f32 %v1280_v60, 0.0  ;;  %1874 = vmatprep.subr.mxu0 %v1998_v4  ;;  %v1773_v60 = vld [vmem:[%s2640_s7] ss:$0 sm:$0xff] }
 0x5af   : > { %1875 = vmatpush3.msra.mxu0 %v1539_v59 }
 0x5b0   : > { %1866 = vmatmul.mubr.msk.f32.vlgmr.msra.gmra.mxu1 %vm733_vm7, %v1281_v61 }
 0x5b1   : > { %1457 = vmatpush1.msra.mxu1 %v1451_v7  ;;  %v1777_v7 = vld [vmem:[%s2641_s8 + $0x1] ss:$0 sm:$0xff] }
 0x5b2   : > { %1458 = vmatprep.subr.mxu1 %v1998_v4 }
 0x5b3   : > { %1459 = vmatpush1.msra.mxu1 %v1450_v8 }
 0x5b4   : > { %1460 = vmatprep.subr.mxu1 %v1998_v4 }
 0x670   : > { %v1354_v63 = vpop.f32.mrf.mxu1 }
 0x671   : > { %v1363_v1 = vmul.f32 %v1770_v62, %v1354_v63  ;;  %v1774_v62 = vld [vmem:[%s2640_s7 + $0x1] ss:$0 sm:$0xff] }
 0x672   : > { %v1867_v2 = vpop.f32.mrf.mxu1 }
 0x673   : > { %v1369_v3 = vadd.f32 %v1771_v0, %v1363_v1 }
 0x675   : > { %v1370_v5 = vadd.f32 %v1369_v3, %v2406_v43  ;;  %v1449_v43 = vld [vmem:[%s2637_s4 + $0x68] sm:$0xff] }
 0x676   : > { %1461 = vmatpush1.msra.mxu1 %v1449_v43 }
 0x677   : > { %v1371_v6 = vmax.f32 %v1370_v5, 0.0  ;;  %1462 = vmatprep.subr.mxu1 %v1998_v4 }
 0x678   : > { %1463 = vmatpush1.msra.mxu1 %v1448_v9 }
 0x679   : > { %1376 = vrot.lane.b32.xlu1 %v1371_v6, %s2658_s21  ;;  %1373 = vrot.lane.b32.xlu0 %v1371_v6, %s2659_s14  ;;  %s2014_s21 = smov 110  }
 0x67a   : > { %1464 = vmatprep.subr.mxu1 %v1998_v4 }
 0x67b   : > { %1465 = vmatpush1.msra.mxu1 %v1447_v10 }
 0x67c   : > { %1466 = vmatprep.subr.mxu1 %v1998_v4 }
 0x67d   : > { %1379 = vrot.lane.b32.xlu0 %v1371_v6, %s2660_s17  ;;  %1467 = vmatpush1.msra.mxu1 %v1446_v11 }
 0x67e   : > { %1468 = vmatprep.subr.mxu1 %v1998_v4 }
 0x67f   : > { %1469 = vmatpush1.msra.mxu1 %v1445_v12 }
 0x680   : > { %1470 = vmatprep.subr.mxu1 %v1998_v4 }
 0x681   : > { %1471 = vmatpush1.msra.mxu1 %v1444_v13 }
 0x682   : > { %1472 = vmatprep.subr.mxu1 %v1998_v4 }
 0x683   : > { %1473 = vmatpush1.msra.mxu1 %v1443_v15 }
 0x684   : > { %1474 = vmatprep.subr.mxu1 %v1998_v4 }
 0x685   : > { %1475 = vmatpush1.msra.mxu1 %v1442_v16 }
 0x686   : > { %1476 = vmatprep.subr.mxu1 %v1998_v4 }
 0x687   : > { %1477 = vmatpush1.msra.mxu1 %v1441_v17 }
 0x688   : > { %1478 = vmatprep.subr.mxu1 %v1998_v4 }
 0x689   : > { %1479 = vmatpush1.msra.mxu1 %v1440_v52 }
 0x68a   : > { %1480 = vmatprep.subr.mxu1 %v1998_v4 }
 0x68b   : > { %1481 = vmatpush1.msra.mxu1 %v1439_v18 }
 0x68c   : > { %1482 = vmatprep.subr.mxu1 %v1998_v4 }
 0x68d   : > { %1483 = vmatpush1.msra.mxu1 %v1438_v20 }
 0x68e   : > { %1484 = vmatprep.subr.mxu1 %v1998_v4 }
 0x68f   : > { %1485 = vmatpush1.msra.mxu1 %v1437_v21 }
 0x690   : > { %1486 = vmatprep.subr.mxu1 %v1998_v4 }
 0x691   : > { %1487 = vmatpush1.msra.mxu1 %v1436_v25 }
 0x692   : > { %1516 = vmatprep.subr.mxu1 %v1998_v4 }
 0x693   : > { %1517 = vmatpush2.msra.mxu1 %v1453_v26 }
 0x694   : > { %1518 = vmatprep.subr.mxu1 %v1998_v4  ;;  %v1776_v4 = vld [vmem:[%s2641_s8] ss:$0 sm:$0xff] }
 0x695   : > { %1519 = vmatpush2.msra.mxu1 %v1452_v33 }
 0x6eb   : > { %v1374_v19 = vpop.permute.xlu0 %1373  ;;  %v1377_v22 = vpop.permute.xlu1 %1376 }
 0x6ec   : > { %v1382_v23 = vsel %vm557_vm2, %v1374_v19, %v1377_v22  ;;  %vm1432_vm2 = vcmask 785408  }
 0x6ef   : > { %v1380_v24 = vpop.permute.xlu0 %1379 }
 0x6f0   : > { %v1383_v27 = vsel %vm559_vm3, %v1382_v23, %v1380_v24  ;;  %vm1434_vm3 = vcmask 916480  }
 0x6f1   : > { %v1385_v28 = vrot.slane %v1383_v27, 1  ;;  %v1387_v29 = vrot.slane %v1383_v27, 7  ;;  %v1389_v30 = vrot.slane %v1383_v27, 5 }
 0x6f3   : > { %v1391_v31 = vsel %vm568_vm4, %v1385_v28, %v1387_v29  ;;  %v1392_v32 = vsel %vm568_vm4, %v1387_v29, %v1389_v30 }
 0x6f4   : > { %1397 = vrot.lane.b32.xlu0 %v1391_v31, %s2008_s1  ;;  %1394 = vrot.lane.b32.xlu1 %v1391_v31, %s2009_s2  ;;  %v1401_v34 = vrot.slane %v1391_v31, 1  ;;  %v1402_v35 = vrot.slane %v1392_v32, 1  ;;  %v1413_v37 = vrot.slane %v1391_v31, 2  ;;  %v1414_v38 = vrot.slane %v1392_v32, 2 }
 0x6f6   : > { %v1403_v36 = vsel %vm617_vm5, %v1401_v34, %v1402_v35  ;;  %v1415_v39 = vsel %vm672_vm6, %v1413_v37, %v1414_v38 }
 0x6f8   : > { %1407 = vrot.lane.b32.xlu0 %v1403_v36, %s2010_s22  ;;  %1404 = vrot.lane.b32.xlu1 %v1403_v36, %s2011_s24  ;;  %s1779_s24 = sshll.u32 %s2087_s13, 7 }
 0x6f9   : > { %s1643_s17 = scalar_lea.hbm %s2642_s9, %s1779_s24 }
 0x6fc   : > { %1416 = vrot.lane.b32.xlu0 %v1415_v39, %s2012_s27  ;;  %1410 = vrot.lane.b32.xlu1 %v1403_v36, %s2013_s23 }
 0x700   : > { %1422 = vrot.lane.b32.xlu0 %v1415_v39, %s2657_s28  ;;  %1419 = vrot.lane.b32.xlu1 %v1415_v39, %s2014_s21  ;;  %s336_s21 = sand.u32 1, %s1988_s10   ;;  %s1721_s28 = sshll.u32 %s2132_s16, 3 }
 0x701   : > { %s1720_s14 = sshll.u32 %s336_s21, 3  ;;  %s342_s25 = scalar_lea.vmem %s2633_s0, %s1721_s28 }
 0x702   : > { %v1616_v5 = vld [vmem:[%s342_s25] sm:$0xff]  ;;  %s338_s16 = scalar_lea.vmem [#allocation2], %s1720_s14  ;;  %s1632_s26 = scalar_lea.sflag [#allocation3], %s336_s21 }
 0x703   : > { %s1645_s27 = sshll.u32 %s338_s16, 4  ;;  %s2015_s25 = smov [#allocation2]   ;;  %s1646_s27 = int_to_ptr.vmem [resolvable:$true] %s1645_s27 }
 0x704   : > { %s1936_s29 = scalar_lea.vmem %s1646_s27, 128  ;;  %s1940_s1 = sshll.u32 %s2015_s25, 4  ;;  %s1941_s1 = int_to_ptr.vmem [resolvable:$false] %s1940_s1 }
 0x705   : > { %p1937_p11 = scmp.ne.s32.totalorder %s1646_s27, %s1936_s29  ;;  %s1942_s13 = scalar_lea.vmem %s1941_s1, 256 }
 0x706   : > { %p1943_p0 = scmp.lt.s32.totalorder %s1646_s27, %s1941_s1  ;;  %p1944_p1 = scmp.lt.s32.totalorder %s1942_s13, %s1936_s29 }
 0x707   : > { %p1938_p12 = pnand %p1937_p11, %p2104_p5 }
 0x708   : > { %p1945_p2 = por %p1944_p1, %p1943_p0 }
 0x709   : > { %p1939_p13 = pneg %p1938_p12 }
 0x70b   : > { %p1946_p3 = pnand %p1945_p2, %p1939_p13 }
 0x766   : > { %v1398_v40 = vpop.permute.xlu0 %1397  ;;  %v1395_v41 = vpop.permute.xlu1 %1394 }
 0x767   : > { %v1424_v42 = vsel %vm733_vm7, %v1391_v31, %v1395_v41 }
 0x768   : > { %v1425_v45 = vsel %vm390_vm1, %v1424_v42, %v1398_v40 }
 0x76a   : > { %v1408_v44 = vpop.permute.xlu0 %1407  ;;  %v1405_v46 = vpop.permute.xlu1 %1404 }
 0x76b   : > { %v1427_v14 = vsel %vm1426_vm14, %v1425_v45, %v1405_v46 }
 0x76c   : > { %v1429_v48 = vsel %vm1428_vm15, %v1427_v14, %v1408_v44 }
 0x76e   : > { %v1417_v47 = vpop.permute.xlu0 %1416  ;;  %v1411_v49 = vpop.permute.xlu1 %1410 }
 0x76f   : > { %v1431_v50 = vsel %vm1430_vm0, %v1429_v48, %v1411_v49 }
 0x770   : > { %v1433_v53 = vsel %vm1432_vm2, %v1431_v50, %v1417_v47 }
 0x772   : > { %v1423_v51 = vpop.permute.xlu0 %1422  ;;  %v1420_v54 = vpop.permute.xlu1 %1419 }
 0x773   : > { %v1435_v55 = vsel %vm1434_vm3, %v1433_v53, %v1420_v54  ;;  %1772 = vmatprep.mubr.msk.f32.mxu1 %vm733_vm7, %v1423_v51 }
 0x774   : > { %1521 = vmatmul.mubr.f32.vlgmr.msra.gmra.mxu1 %v1435_v55 }
 0x834   : > { %v1522_v61 = vpop.f32.mrf.mxu1 }
 0x835   : > { %v1531_v63 = vmul.f32 %v1773_v60, %v1522_v61 }
 0x836   : > { %v1524_v0 = vpop.f32.mrf.mxu1 }
 0x837   : > { %v1537_v1 = vadd.f32 %v1774_v62, %v1531_v63 }
 0x839   : > { %v1538_v2 = vmax.f32 %v1537_v1, 0.0 }
 0x83b   : > { %1877 = vmatmul.mubr.msk.f32.vlgmr.msra.gmra.mxu0 %vm390_vm1, %v1538_v2 }
 0x8fb   : > { %v1612_v3 = vpop.f32.mrf.mxu0 }
 0x8fc   : > { %v1622_v6 = vmul.f32 %v1776_v4, %v1612_v3 }
 0x8fd   : > { %v1878_v8 = vpop.f32.mrf.mxu0 }
 0x8fe   : > { %v1623_v43 = vadd.f32 %v1622_v6, %v1616_v5 }
 0x900   : > { %v1629_v9 = vadd.f32 %v1777_v7, %v1623_v43 }
 0x902   : > { %1630 = vst [vmem:[%s338_s16] sm:$0xff] %v1629_v9 }
 0x903   : > { %1949 = shalt.err (!%p1946_p3)
}
 0x904   : > { %s1950_s14 = scalar_lea.hbm %s1643_s17, 128  ;;  %s1954_s22 = scalar_lea.hbm %s2642_s9, 256 }
 0x905   : > { %p1951_p4 = scmp.ne.s32.totalorder %s1643_s17, %s1950_s14  ;;  %p1955_p9 = scmp.lt.s32.totalorder %s1643_s17, %s2642_s9 }
 0x906   : > { %p1956_p10 = scmp.lt.s32.totalorder %s1954_s22, %s1950_s14 }
 0x907   : > { %p1952_p7 = pnand %p1951_p4, %p2104_p5 }
 0x908   : > { %p1957_p11 = por %p1956_p10, %p1955_p9 }
 0x909   : > { %p1953_p8 = pneg %p1952_p7 }
 0x90b   : > { %p1958_p12 = pnand %p1957_p11, %p1953_p8 }
 0x90d   : > { %1961 = shalt.err (!%p1958_p12)
}
 0x90e   : > { %1880 = dma.vmem_to_hbm [thread:$0]  (%p2104_p5), %s1646_s27, 128, %s1643_s17, %s1632_s26  }
 0x90f PF: > { %p1886_p13 = scmp.ge.s32.totalorder %s1996_s12, 2  ;;  %s1657_s23 = sand.u32 1, %s1984_s30  }
 0x910   : > { %s1658_s28 = scalar_lea.sflag [#allocation3], %s1657_s23 }
 0x911   : > { %p1883_p0 = pnand %p1886_p13, %p2108_p6 }
 0x913   : > { %p1884_p1 = pneg %p1883_p0 }
 0x915   : > { %1979 = dma.done.wait (%p1884_p1), %s1658_s28, 128  }
 0x916   : > { %1981 = vsyncadd (%p1884_p1), %s1658_s28, 4294967168  ;;  %p19_p2 = scmp.ge.s32.totalorder %s2091_s15, 4   ;;  %s2661_s30 = smov %s1988_s10 }
 0x917   : > { %s2662_s10 = smov %s1992_s11  ;;  %s2663_s11 = smov %s2102_s18 }
 0x918   : > { %s2664_s12 = smov %s2091_s15  ;;  %21 = sbr.rel (!%p19_p2) target bundleno = 6 (0x6), region = 96 }
 0x91d   :  { %1663 = vsyncpa [#allocation3], 1 }
 0x91e   :  { %1665 = vsyncpa [#allocation3 + $0x1], 1 }

</bundles_post_ra>
